<compile_context>
chip_gen: v7x
topology: tpu7x:2x2x1
jax: 0.10.0
libtpu: 0.0.40
codegen_flags: <defaults>
</compile_context>

<pallas_src>
import jax
import jax.numpy as jnp
from jax.experimental import pallas as pl
from jax.experimental.pallas import tpu as pltpu


def _round_up(x, m):
    return ((x + m - 1) // m) * m


# ---------------------------------------------------------------------------
# Single-step kernel: forward(input, hidden) -> (output, new_hidden)
#   xh = [x | h_pad]  (concatenated in the wrapper),  g = xh @ Wcat + bcat
#   Wcat column blocks (each Hp lanes): [ r | z | n_input | n_hidden ]
# ---------------------------------------------------------------------------
def rnn_step_kernel(xh_ref, h_ref, wcat_ref, bcat_ref, w1_ref, b1_ref,
                    out_ref, newh_ref):
    Hp = h_ref.shape[-1]
    h = h_ref[...]

    g = (jnp.dot(xh_ref[...], wcat_ref[...], preferred_element_type=jnp.float32)
         + bcat_ref[...])                                    # (B, 4Hp), one MXU push
    r = jax.nn.sigmoid(g[:, :Hp])
    z = jax.nn.sigmoid(g[:, Hp:2 * Hp])
    n = jnp.tanh(g[:, 2 * Hp:3 * Hp] + r * g[:, 3 * Hp:4 * Hp])
    h_new = n + z * (h - n)                                  # == (1-z)*n + z*h

    out_ref[...] = (jnp.dot(h_new, w1_ref[...], preferred_element_type=jnp.float32)
                    + b1_ref[...]).astype(out_ref.dtype)
    newh_ref[...] = h_new.astype(newh_ref.dtype)


def rnn_actor_forward(x, hidden, prep):
    """Module-equivalent single step. x: (B, Din), hidden: (B, H)."""
    B, Din = x.shape
    H = prep["hidden_dim"]
    Hp = prep["padded_hidden_dim"]
    Dout = prep["output_dim"]
    Dp = prep["padded_output_dim"]

    # Pad hidden to a vreg-aligned lane width and concatenate [x | h] in XLA
    # (not in-kernel), so the kernel needs only one gate matmul.
    h_p = jnp.zeros((B, Hp), jnp.float32).at[:, :H].set(hidden)
    xh = jnp.concatenate([x, h_p], axis=1)                   # (B, Din + Hp)

    flops = 2 * B * ((Din + Hp) * 4 * Hp + Hp * Dp)
    trans = B * 3 * Hp
    bytes_accessed = 4 * (xh.size + h_p.size + prep["wcat"].size + prep["bcat"].size
                          + prep["w1t"].size + prep["b1"].size + B * Dp + B * Hp)

    vmem = pl.BlockSpec(memory_space=pltpu.VMEM)
    out_p, newh_p = pl.pallas_call(
        rnn_step_kernel,
        out_shape=(jax.ShapeDtypeStruct((B, Dp), jnp.float32),
                   jax.ShapeDtypeStruct((B, Hp), jnp.float32)),
        in_specs=[vmem] * 6,
        out_specs=(vmem, vmem),
        cost_estimate=pl.CostEstimate(flops=int(flops), transcendentals=int(trans),
                                      bytes_accessed=int(bytes_accessed)),
    )(xh, h_p, prep["wcat"], prep["bcat"], prep["w1t"], prep["b1"])
    return out_p[:, :Dout], newh_p[:, :H]


# ---------------------------------------------------------------------------
# Chunked multi-timestep kernel.
#   grid = (T // TC,); per chunk:
#     1. one batched input projection (TC*B rows)           -- off serial chain
#     2. TC fully-unrolled recurrent steps (only h @ Wgh)    -- serial
#     3. one batched Dense_1 + one lane-dense y store        -- off serial chain
# ---------------------------------------------------------------------------
def rnn_seq_kernel(x_ref, h0_ref, wgx_ref, bgx_ref, wgh_ref, bhn_ref,
                   w1_ref, b1_ref, y_ref, hfin_ref, h_scr):
    TC, B, Din = x_ref.shape
    Hp = h_scr.shape[-1]

    @pl.when(pl.program_id(0) == 0)
    def _():
        h_scr[...] = h0_ref[...]

    # (1) Hoisted, batched input projection for the whole chunk.
    xf = x_ref[...].reshape(TC * B, Din)
    gx = (jnp.dot(xf, wgx_ref[...], preferred_element_type=jnp.float32)
          + bgx_ref[...]).reshape(TC, B, 3 * Hp)

    wgh = wgh_ref[...]
    bhn = jnp.broadcast_to(bhn_ref[...], (B, Hp))     # hoisted broadcast (n-gate bias)

    # (2) Serial recurrence, fully unrolled (TC is small & static).
    h = h_scr[...]
    hs = []
    for t in range(TC):
        gh = jnp.dot(h, wgh, preferred_element_type=jnp.float32)   # only serial matmul
        gxt = gx[t]                                                 # static slice
        r = jax.nn.sigmoid(gxt[:, :Hp] + gh[:, :Hp])
        z = jax.nn.sigmoid(gxt[:, Hp:2 * Hp] + gh[:, Hp:2 * Hp])
        n = jnp.tanh(gxt[:, 2 * Hp:] + r * (gh[:, 2 * Hp:] + bhn))
        h = n + z * (h - n)
        hs.append(h)
    h_scr[...] = h
    hfin_ref[...] = h

    # (3) Deferred Dense_1: one batched matmul + one lane-dense store per chunk.
    h_all = jnp.concatenate(hs, axis=0)                             # (TC*B, Hp)
    y = jnp.dot(h_all, w1_ref[...], preferred_element_type=jnp.float32) + b1_ref[...]
    y_ref[...] = y.reshape(TC, B, y_ref.shape[-1]).astype(y_ref.dtype)


def rnn_actor_forward_seq(x_seq, hidden0, prep, chunk=None):
    """Run T timesteps in one kernel. x_seq: (T, B, Din). Returns (ys, h_final)."""
    T, B, Din = x_seq.shape
    H = prep["hidden_dim"]
    Hp = prep["padded_hidden_dim"]
    Dout = prep["output_dim"]
    Dp = prep["padded_output_dim"]

    if chunk is None:  # largest divisor of T that is <= 32
        chunk = next(c for c in range(min(T, 32), 0, -1) if T % c == 0)
    assert T % chunk == 0, "sequence length must be divisible by the chunk size"
    num_chunks = T // chunk

    h0p = jnp.zeros((B, Hp), jnp.float32).at[:, :H].set(hidden0)

    grid_spec = pltpu.PrefetchScalarGridSpec(
        num_scalar_prefetch=0,
        grid=(num_chunks,),
        in_specs=[
            pl.BlockSpec((chunk, B, Din), lambda c: (c, 0, 0)),   # x chunk (new each step)
            pl.BlockSpec((B, Hp), lambda c: (0, 0)),              # h0  (resident)
            pl.BlockSpec((Din, 3 * Hp), lambda c: (0, 0)),        # Wgx (resident)
            pl.BlockSpec((1, 3 * Hp), lambda c: (0, 0)),          # bgx (resident)
            pl.BlockSpec((Hp, 3 * Hp), lambda c: (0, 0)),         # Wgh (resident)
            pl.BlockSpec((1, Hp), lambda c: (0, 0)),              # b_hh,n (resident)
            pl.BlockSpec((Hp, Dp), lambda c: (0, 0)),             # W1  (resident)
            pl.BlockSpec((1, Dp), lambda c: (0, 0)),              # b1  (resident)
        ],
        out_specs=(
            pl.BlockSpec((chunk, B, Dp), lambda c: (c, 0, 0)),    # y chunk (lane-dense)
            pl.BlockSpec((B, Hp), lambda c: (0, 0)),              # final hidden
        ),
        scratch_shapes=[pltpu.VMEM((B, Hp), jnp.float32)],        # carried hidden state
    )

    flops = 2 * T * B * (Din * 3 * Hp + Hp * 3 * Hp + Hp * Dp)
    trans = T * B * 3 * Hp
    bytes_accessed = 4 * (x_seq.size + B * Hp + prep["wgx"].size + prep["bgx"].size
                          + prep["wgh"].size + prep["bhn"].size + prep["w1t"].size
                          + prep["b1"].size + T * B * Dp + B * Hp)

    y_p, h_fin_p = pl.pallas_call(
        rnn_seq_kernel,
        out_shape=(jax.ShapeDtypeStruct((T, B, Dp), jnp.float32),
                   jax.ShapeDtypeStruct((B, Hp), jnp.float32)),
        grid_spec=grid_spec,
        compiler_params=pltpu.CompilerParams(dimension_semantics=("arbitrary",)),
        cost_estimate=pl.CostEstimate(flops=int(flops), transcendentals=int(trans),
                                      bytes_accessed=int(bytes_accessed)),
    )(x_seq, h0p, prep["wgx"], prep["bgx"], prep["wgh"], prep["bhn"],
      prep["w1t"], prep["b1"])
    return y_p[:, :, :Dout], h_fin_p[:, :H]


# ---------------------------------------------------------------------------
# Parameter handling (PyTorch-native shapes in, fused/padded kernel weights out)
# ---------------------------------------------------------------------------
def init_params(key, input_dim, output_dim, hidden_dim):
    """Deterministic synthetic parameters with PyTorch-native shapes."""
    ks = jax.random.split(key, 8)
    scale = 0.1
    return {
        "w0":   scale * jax.random.normal(ks[0], (hidden_dim, input_dim), jnp.float32),
        "b0":   scale * jax.random.normal(ks[1], (hidden_dim,), jnp.float32),
        "w_ih": scale * jax.random.normal(ks[2], (3 * hidden_dim, hidden_dim), jnp.float32),
        "b_ih": scale * jax.random.normal(ks[3], (3 * hidden_dim,), jnp.float32),
        "w_hh": scale * jax.random.normal(ks[4], (3 * hidden_dim, hidden_dim), jnp.float32),
        "b_hh": scale * jax.random.normal(ks[5], (3 * hidden_dim,), jnp.float32),
        "w1":   scale * jax.random.normal(ks[6], (output_dim, hidden_dim), jnp.float32),
        "b1":   scale * jax.random.normal(ks[7], (output_dim,), jnp.float32),
    }


def prepare_params(params):
    """Offline weight fusion & vreg-aligned packing.

    * Dense_0 folded into the GRU input projection (W_fused = W0^T @ W_ih^T).
    * Each gate occupies its own 128-lane column block (Hp = round_up(H,128)),
      so in-kernel gate slices are vreg-aligned; when H % 128 == 0 there is no
      zero-column waste.
    * r/z biases fully folded into the input-projection bias.
    * Dense_1 row-padded (Hp) and lane-padded (Dp) for unmasked stores.
    * Single-step path gets a pre-packed (Din+Hp, 4Hp) [x|h] weight.
    """
    w0t = params["w0"].T            # (Din, H)
    wih_t = params["w_ih"].T        # (H, 3H)  columns [r | z | n]
    whh_t = params["w_hh"].T        # (H, 3H)
    Din, H = w0t.shape
    Dout = params["w1"].shape[0]
    Hp = _round_up(H, 128)
    Dp = _round_up(Dout, 128)

    fused_x = w0t @ wih_t                               # (Din, 3H): Dense_0 ∘ W_ih
    b_ih_f = params["b0"] @ wih_t + params["b_ih"]      # (3H,)
    b_hh = params["b_hh"]                               # (3H,)

    # ---- sequence-kernel layout: 3 blocks of Hp lanes, [ r | z | n ] --------
    wgx = jnp.zeros((Din, 3 * Hp), jnp.float32)
    wgh = jnp.zeros((Hp, 3 * Hp), jnp.float32)
    bgx = jnp.zeros((1, 3 * Hp), jnp.float32)
    bgx_small = [b_ih_f[:H] + b_hh[:H],              # r bias fully folded
                 b_ih_f[H:2 * H] + b_hh[H:2 * H],    # z bias fully folded
                 b_ih_f[2 * H:]]                     # n input-side bias only
    for b in range(3):
        wgx = wgx.at[:, b * Hp: b * Hp + H].set(fused_x[:, b * H:(b + 1) * H])
        wgh = wgh.at[:H, b * Hp: b * Hp + H].set(whh_t[:, b * H:(b + 1) * H])
        bgx = bgx.at[0, b * Hp: b * Hp + H].set(bgx_small[b])
    bhn = jnp.zeros((1, Hp), jnp.float32).at[0, :H].set(b_hh[2 * H:])   # n hidden-side bias

    # ---- single-step layout: [x | h_pad] against 4 blocks [r|z|n_in|n_h] ----
    wcat = jnp.zeros((Din + Hp, 4 * Hp), jnp.float32)
    for b in range(3):   # x rows contribute to r, z, n_input
        wcat = wcat.at[:Din, b * Hp: b * Hp + H].set(fused_x[:, b * H:(b + 1) * H])
    # h rows contribute to r, z, n_hidden
    wcat = wcat.at[Din:Din + H, 0 * Hp: 0 * Hp + H].set(whh_t[:, :H])
    wcat = wcat.at[Din:Din + H, 1 * Hp: 1 * Hp + H].set(whh_t[:, H:2 * H])
    wcat = wcat.at[Din:Din + H, 3 * Hp: 3 * Hp + H].set(whh_t[:, 2 * H:])
    bcat = jnp.zeros((1, 4 * Hp), jnp.float32)
    bcat = bcat.at[0, 0 * Hp: 0 * Hp + H].set(b_ih_f[:H] + b_hh[:H])
    bcat = bcat.at[0, 1 * Hp: 1 * Hp + H].set(b_ih_f[H:2 * H] + b_hh[H:2 * H])
    bcat = bcat.at[0, 2 * Hp: 2 * Hp + H].set(b_ih_f[2 * H:])
    bcat = bcat.at[0, 3 * Hp: 3 * Hp + H].set(b_hh[2 * H:])

    # ---- Dense_1, row- and lane-padded for unmasked lane-dense stores -------
    w1t = jnp.zeros((Hp, Dp), jnp.float32).at[:H, :Dout].set(params["w1"].T)
    b1 = jnp.zeros((1, Dp), jnp.float32).at[0, :Dout].set(params["b1"])

    return {"wgx": wgx, "wgh": wgh, "bgx": bgx, "bhn": bhn,
            "wcat": wcat, "bcat": bcat, "w1t": w1t, "b1": b1,
            "hidden_dim": H, "padded_hidden_dim": Hp,
            "output_dim": Dout, "padded_output_dim": Dp, "input_dim": Din}


# ---------------------------------------------------------------------------
# Pure-JAX references (PyTorch nn.Linear / nn.GRUCell semantics)
# ---------------------------------------------------------------------------
def rnn_actor_reference(x, hidden, p):
    emb = x @ p["w0"].T + p["b0"]
    gi = emb @ p["w_ih"].T + p["b_ih"]
    gh = hidden @ p["w_hh"].T + p["b_hh"]
    H = hidden.shape[-1]
    r = jax.nn.sigmoid(gi[:, :H] + gh[:, :H])
    z = jax.nn.sigmoid(gi[:, H:2 * H] + gh[:, H:2 * H])
    n = jnp.tanh(gi[:, 2 * H:] + r * gh[:, 2 * H:])
    h_new = (1.0 - z) * n + z * hidden
    out = h_new @ p["w1"].T + p["b1"]
    return out, h_new


def rnn_actor_reference_seq(x_seq, hidden, p):
    def step(h, x):
        out, h_new = rnn_actor_reference(x, h, p)
        return h_new, out
    h_fin, ys = jax.lax.scan(step, hidden, x_seq)
    return ys, h_fin


if __name__ == "__main__":
    batch = 8
    input_dim = 16
    hidden_dim = 32
    output_dim = 8
    seq_len = 16
    chunk = 8            # 2 chunks -> exercises the carried-hidden path

    key = jax.random.PRNGKey(0)
    k_x, k_h, k_p, k_xs = jax.random.split(key, 4)
    x = jax.random.normal(k_x, (batch, input_dim), jnp.float32)
    hidden = jax.random.normal(k_h, (batch, hidden_dim), jnp.float32)
    x_seq = jax.random.normal(k_xs, (seq_len, batch, input_dim), jnp.float32)
    params = init_params(k_p, input_dim, output_dim, hidden_dim)
    prep = prepare_params(params)

    # Pure-JAX references.
    ref_out, ref_h = rnn_actor_reference(x, hidden, params)
    ref_ys, ref_hfin = rnn_actor_reference_seq(x_seq, hidden, params)

    # Chunked multi-timestep kernel (weights + hidden state resident in VMEM).
    ys, h_fin = rnn_actor_forward_seq(x_seq, hidden, prep, chunk=chunk)
    jax.block_until_ready((ys, h_fin))

    # Module-equivalent single-step kernel.
    out, new_hidden = rnn_actor_forward(x, hidden, prep)
    jax.block_until_ready((out, new_hidden))

    assert jnp.allclose(out, ref_out, atol=1e-5, rtol=1e-4), "step output mismatch"
    assert jnp.allclose(new_hidden, ref_h, atol=1e-5, rtol=1e-4), "step hidden mismatch"
    assert jnp.allclose(ys, ref_ys, atol=1e-4, rtol=1e-4), "seq output mismatch"
    assert jnp.allclose(h_fin, ref_hfin, atol=1e-4, rtol=1e-4), "seq hidden mismatch"

    print("KERNEL_OK")
</pallas_src>

<mosaic_0001>
module attributes {stable_mosaic.version = 11 : i64} {
  func.func @rnn_seq_kernel(%arg0: i32, %arg1: memref<8x8x16xf32, #tpu.memory_space<vmem>>, %arg2: memref<8x128xf32, #tpu.memory_space<vmem>>, %arg3: memref<16x384xf32, #tpu.memory_space<vmem>>, %arg4: memref<1x384xf32, #tpu.memory_space<vmem>>, %arg5: memref<128x384xf32, #tpu.memory_space<vmem>>, %arg6: memref<1x128xf32, #tpu.memory_space<vmem>>, %arg7: memref<128x128xf32, #tpu.memory_space<vmem>>, %arg8: memref<1x128xf32, #tpu.memory_space<vmem>>, %arg9: memref<8x8x128xf32, #tpu.memory_space<vmem>>, %arg10: memref<8x128xf32, #tpu.memory_space<vmem>>, %arg11: memref<8x128xf32, #tpu.memory_space<vmem>>) attributes {dimension_semantics = [#tpu.dimension_semantics<arbitrary>], iteration_bounds = array<i64: 2>, scalar_prefetch = 0 : i64, scratch_operands = 1 : i64, tpu.core_type = #tpu.core_type<tc>, window_params = [{transform_indices = @transform_0, window_bounds = array<i64: 8, 8, 16>}, {pipeline_mode = #tpu.pipeline_mode<synchronous>, transform_indices = @transform_1, window_bounds = array<i64: 8, 128>}, {pipeline_mode = #tpu.pipeline_mode<synchronous>, transform_indices = @transform_2, window_bounds = array<i64: 16, 384>}, {pipeline_mode = #tpu.pipeline_mode<synchronous>, transform_indices = @transform_3, window_bounds = array<i64: 1, 384>}, {pipeline_mode = #tpu.pipeline_mode<synchronous>, transform_indices = @transform_4, window_bounds = array<i64: 128, 384>}, {pipeline_mode = #tpu.pipeline_mode<synchronous>, transform_indices = @transform_5, window_bounds = array<i64: 1, 128>}, {pipeline_mode = #tpu.pipeline_mode<synchronous>, transform_indices = @transform_6, window_bounds = array<i64: 128, 128>}, {pipeline_mode = #tpu.pipeline_mode<synchronous>, transform_indices = @transform_7, window_bounds = array<i64: 1, 128>}, {transform_indices = @transform_8, window_bounds = array<i64: 8, 8, 128>}, {pipeline_mode = #tpu.pipeline_mode<synchronous>, transform_indices = @transform_9, window_bounds = array<i64: 8, 128>}]} {
    %c0_i32 = arith.constant 0 : i32
    %0 = arith.cmpi eq, %arg0, %c0_i32 : i32
    %1 = arith.extui %0 : i1 to i32
    %c0_i32_0 = arith.constant 0 : i32
    %2 = arith.cmpi ne, %1, %c0_i32_0 : i32
    scf.if %2 {
      %c0_49 = arith.constant 0 : index
      %c0_50 = arith.constant 0 : index
      %250 = vector.load %arg2[%c0_49, %c0_50] : memref<8x128xf32, #tpu.memory_space<vmem>>, vector<8x128xf32>
      %c0_51 = arith.constant 0 : index
      %c0_52 = arith.constant 0 : index
      %251 = vector.load %arg11[%c0_51, %c0_52] : memref<8x128xf32, #tpu.memory_space<vmem>>, vector<8x128xf32>
      tpu.vector_store %arg11[%c0_51, %c0_52], %250 {strides = array<i32>} : memref<8x128xf32, #tpu.memory_space<vmem>>, vector<8x128xf32>,
    } else {
    }
    %c0 = arith.constant 0 : index
    %c0_1 = arith.constant 0 : index
    %c0_2 = arith.constant 0 : index
    %3 = vector.load %arg1[%c0, %c0_1, %c0_2] : memref<8x8x16xf32, #tpu.memory_space<vmem>>, vector<8x8x16xf32>
    %4 = vector.shape_cast %3 : vector<8x8x16xf32> to vector<64x16xf32>
    %c0_3 = arith.constant 0 : index
    %c0_4 = arith.constant 0 : index
    %5 = vector.load %arg3[%c0_3, %c0_4] : memref<16x384xf32, #tpu.memory_space<vmem>>, vector<16x384xf32>
    %cst = arith.constant dense<0.000000e+00> : vector<64x384xf32>
    %6 = tpu.matmul %4, %5, %cst {dimension_numbers = #tpu.dot_dimension_numbers<[1], [0], [0], [1], [0, 0, 1, 1], [], []>} : vector<64x16xf32>, vector<16x384xf32>, vector<64x384xf32> -> vector<64x384xf32>
    %c0_5 = arith.constant 0 : index
    %c0_6 = arith.constant 0 : index
    %7 = vector.load %arg4[%c0_5, %c0_6] : memref<1x384xf32, #tpu.memory_space<vmem>>, vector<1x384xf32>
    %8 = vector.broadcast %7 : vector<1x384xf32> to vector<64x384xf32>
    %9 = arith.addf %6, %8 : vector<64x384xf32>
    %10 = vector.shape_cast %9 : vector<64x384xf32> to vector<8x8x384xf32>
    %c0_7 = arith.constant 0 : index
    %c0_8 = arith.constant 0 : index
    %11 = vector.load %arg5[%c0_7, %c0_8] : memref<128x384xf32, #tpu.memory_space<vmem>>, vector<128x384xf32>
    %c0_9 = arith.constant 0 : index
    %c0_10 = arith.constant 0 : index
    %12 = vector.load %arg6[%c0_9, %c0_10] : memref<1x128xf32, #tpu.memory_space<vmem>>, vector<1x128xf32>
    %13 = vector.shape_cast %12 : vector<1x128xf32> to vector<1x128xf32>
    %14 = vector.broadcast %13 : vector<1x128xf32> to vector<8x128xf32>
    %c0_11 = arith.constant 0 : index
    %c0_12 = arith.constant 0 : index
    %15 = vector.load %arg11[%c0_11, %c0_12] : memref<8x128xf32, #tpu.memory_space<vmem>>, vector<8x128xf32>
    %cst_13 = arith.constant dense<0.000000e+00> : vector<8x384xf32>
    %16 = tpu.matmul %15, %11, %cst_13 {dimension_numbers = #tpu.dot_dimension_numbers<[1], [0], [0], [1], [0, 0, 1, 1], [], []>} : vector<8x128xf32>, vector<128x384xf32>, vector<8x384xf32> -> vector<8x384xf32>
    %17 = vector.extract_strided_slice %10 {offsets = [0, 0, 0], sizes = [1, 8, 384], strides = [1, 1, 1]} : vector<8x8x384xf32> to vector<1x8x384xf32>
    %18 = vector.shape_cast %17 : vector<1x8x384xf32> to vector<8x384xf32>
    %19 = vector.extract_strided_slice %18 {offsets = [0, 0], sizes = [8, 128], strides = [1, 1]} : vector<8x384xf32> to vector<8x128xf32>
    %20 = vector.extract_strided_slice %16 {offsets = [0, 0], sizes = [8, 128], strides = [1, 1]} : vector<8x384xf32> to vector<8x128xf32>
    %21 = arith.addf %19, %20 : vector<8x128xf32>
    %22 = arith.negf %21 : vector<8x128xf32>
    %23 = math.exp %22 : vector<8x128xf32>
    %cst_14 = arith.constant 1.000000e+00 : f32
    %24 = vector.broadcast %cst_14 : f32 to vector<8x128xf32>
    %25 = arith.addf %24, %23 : vector<8x128xf32>
    %26 = arith.divf %24, %25 : vector<8x128xf32>
    %27 = vector.extract_strided_slice %18 {offsets = [0, 128], sizes = [8, 128], strides = [1, 1]} : vector<8x384xf32> to vector<8x128xf32>
    %28 = vector.extract_strided_slice %16 {offsets = [0, 128], sizes = [8, 128], strides = [1, 1]} : vector<8x384xf32> to vector<8x128xf32>
    %29 = arith.addf %27, %28 : vector<8x128xf32>
    %30 = arith.negf %29 : vector<8x128xf32>
    %31 = math.exp %30 : vector<8x128xf32>
    %cst_15 = arith.constant 1.000000e+00 : f32
    %32 = vector.broadcast %cst_15 : f32 to vector<8x128xf32>
    %33 = arith.addf %32, %31 : vector<8x128xf32>
    %34 = arith.divf %32, %33 : vector<8x128xf32>
    %35 = vector.extract_strided_slice %18 {offsets = [0, 256], sizes = [8, 128], strides = [1, 1]} : vector<8x384xf32> to vector<8x128xf32>
    %36 = vector.extract_strided_slice %16 {offsets = [0, 256], sizes = [8, 128], strides = [1, 1]} : vector<8x384xf32> to vector<8x128xf32>
    %37 = arith.addf %36, %14 : vector<8x128xf32>
    %38 = arith.mulf %26, %37 : vector<8x128xf32>
    %39 = arith.addf %35, %38 : vector<8x128xf32>
    %40 = math.tanh %39 : vector<8x128xf32>
    %41 = arith.subf %15, %40 : vector<8x128xf32>
    %42 = arith.mulf %34, %41 : vector<8x128xf32>
    %43 = arith.addf %40, %42 : vector<8x128xf32>
    %cst_16 = arith.constant dense<0.000000e+00> : vector<8x384xf32>
    %44 = tpu.matmul %43, %11, %cst_16 {dimension_numbers = #tpu.dot_dimension_numbers<[1], [0], [0], [1], [0, 0, 1, 1], [], []>} : vector<8x128xf32>, vector<128x384xf32>, vector<8x384xf32> -> vector<8x384xf32>
    %45 = vector.extract_strided_slice %10 {offsets = [1, 0, 0], sizes = [1, 8, 384], strides = [1, 1, 1]} : vector<8x8x384xf32> to vector<1x8x384xf32>
    %46 = vector.shape_cast %45 : vector<1x8x384xf32> to vector<8x384xf32>
    %47 = vector.extract_strided_slice %46 {offsets = [0, 0], sizes = [8, 128], strides = [1, 1]} : vector<8x384xf32> to vector<8x128xf32>
    %48 = vector.extract_strided_slice %44 {offsets = [0, 0], sizes = [8, 128], strides = [1, 1]} : vector<8x384xf32> to vector<8x128xf32>
    %49 = arith.addf %47, %48 : vector<8x128xf32>
    %50 = arith.negf %49 : vector<8x128xf32>
    %51 = math.exp %50 : vector<8x128xf32>
    %cst_17 = arith.constant 1.000000e+00 : f32
    %52 = vector.broadcast %cst_17 : f32 to vector<8x128xf32>
    %53 = arith.addf %52, %51 : vector<8x128xf32>
    %54 = arith.divf %52, %53 : vector<8x128xf32>
    %55 = vector.extract_strided_slice %46 {offsets = [0, 128], sizes = [8, 128], strides = [1, 1]} : vector<8x384xf32> to vector<8x128xf32>
    %56 = vector.extract_strided_slice %44 {offsets = [0, 128], sizes = [8, 128], strides = [1, 1]} : vector<8x384xf32> to vector<8x128xf32>
    %57 = arith.addf %55, %56 : vector<8x128xf32>
    %58 = arith.negf %57 : vector<8x128xf32>
    %59 = math.exp %58 : vector<8x128xf32>
    %cst_18 = arith.constant 1.000000e+00 : f32
    %60 = vector.broadcast %cst_18 : f32 to vector<8x128xf32>
    %61 = arith.addf %60, %59 : vector<8x128xf32>
    %62 = arith.divf %60, %61 : vector<8x128xf32>
    %63 = vector.extract_strided_slice %46 {offsets = [0, 256], sizes = [8, 128], strides = [1, 1]} : vector<8x384xf32> to vector<8x128xf32>
    %64 = vector.extract_strided_slice %44 {offsets = [0, 256], sizes = [8, 128], strides = [1, 1]} : vector<8x384xf32> to vector<8x128xf32>
    %65 = arith.addf %64, %14 : vector<8x128xf32>
    %66 = arith.mulf %54, %65 : vector<8x128xf32>
    %67 = arith.addf %63, %66 : vector<8x128xf32>
    %68 = math.tanh %67 : vector<8x128xf32>
    %69 = arith.subf %43, %68 : vector<8x128xf32>
    %70 = arith.mulf %62, %69 : vector<8x128xf32>
    %71 = arith.addf %68, %70 : vector<8x128xf32>
    %cst_19 = arith.constant dense<0.000000e+00> : vector<8x384xf32>
    %72 = tpu.matmul %71, %11, %cst_19 {dimension_numbers = #tpu.dot_dimension_numbers<[1], [0], [0], [1], [0, 0, 1, 1], [], []>} : vector<8x128xf32>, vector<128x384xf32>, vector<8x384xf32> -> vector<8x384xf32>
    %73 = vector.extract_strided_slice %10 {offsets = [2, 0, 0], sizes = [1, 8, 384], strides = [1, 1, 1]} : vector<8x8x384xf32> to vector<1x8x384xf32>
    %74 = vector.shape_cast %73 : vector<1x8x384xf32> to vector<8x384xf32>
    %75 = vector.extract_strided_slice %74 {offsets = [0, 0], sizes = [8, 128], strides = [1, 1]} : vector<8x384xf32> to vector<8x128xf32>
    %76 = vector.extract_strided_slice %72 {offsets = [0, 0], sizes = [8, 128], strides = [1, 1]} : vector<8x384xf32> to vector<8x128xf32>
    %77 = arith.addf %75, %76 : vector<8x128xf32>
    %78 = arith.negf %77 : vector<8x128xf32>
    %79 = math.exp %78 : vector<8x128xf32>
    %cst_20 = arith.constant 1.000000e+00 : f32
    %80 = vector.broadcast %cst_20 : f32 to vector<8x128xf32>
    %81 = arith.addf %80, %79 : vector<8x128xf32>
    %82 = arith.divf %80, %81 : vector<8x128xf32>
    %83 = vector.extract_strided_slice %74 {offsets = [0, 128], sizes = [8, 128], strides = [1, 1]} : vector<8x384xf32> to vector<8x128xf32>
    %84 = vector.extract_strided_slice %72 {offsets = [0, 128], sizes = [8, 128], strides = [1, 1]} : vector<8x384xf32> to vector<8x128xf32>
    %85 = arith.addf %83, %84 : vector<8x128xf32>
    %86 = arith.negf %85 : vector<8x128xf32>
    %87 = math.exp %86 : vector<8x128xf32>
    %cst_21 = arith.constant 1.000000e+00 : f32
    %88 = vector.broadcast %cst_21 : f32 to vector<8x128xf32>
    %89 = arith.addf %88, %87 : vector<8x128xf32>
    %90 = arith.divf %88, %89 : vector<8x128xf32>
    %91 = vector.extract_strided_slice %74 {offsets = [0, 256], sizes = [8, 128], strides = [1, 1]} : vector<8x384xf32> to vector<8x128xf32>
    %92 = vector.extract_strided_slice %72 {offsets = [0, 256], sizes = [8, 128], strides = [1, 1]} : vector<8x384xf32> to vector<8x128xf32>
    %93 = arith.addf %92, %14 : vector<8x128xf32>
    %94 = arith.mulf %82, %93 : vector<8x128xf32>
    %95 = arith.addf %91, %94 : vector<8x128xf32>
    %96 = math.tanh %95 : vector<8x128xf32>
    %97 = arith.subf %71, %96 : vector<8x128xf32>
    %98 = arith.mulf %90, %97 : vector<8x128xf32>
    %99 = arith.addf %96, %98 : vector<8x128xf32>
    %cst_22 = arith.constant dense<0.000000e+00> : vector<8x384xf32>
    %100 = tpu.matmul %99, %11, %cst_22 {dimension_numbers = #tpu.dot_dimension_numbers<[1], [0], [0], [1], [0, 0, 1, 1], [], []>} : vector<8x128xf32>, vector<128x384xf32>, vector<8x384xf32> -> vector<8x384xf32>
    %101 = vector.extract_strided_slice %10 {offsets = [3, 0, 0], sizes = [1, 8, 384], strides = [1, 1, 1]} : vector<8x8x384xf32> to vector<1x8x384xf32>
    %102 = vector.shape_cast %101 : vector<1x8x384xf32> to vector<8x384xf32>
    %103 = vector.extract_strided_slice %102 {offsets = [0, 0], sizes = [8, 128], strides = [1, 1]} : vector<8x384xf32> to vector<8x128xf32>
    %104 = vector.extract_strided_slice %100 {offsets = [0, 0], sizes = [8, 128], strides = [1, 1]} : vector<8x384xf32> to vector<8x128xf32>
    %105 = arith.addf %103, %104 : vector<8x128xf32>
    %106 = arith.negf %105 : vector<8x128xf32>
    %107 = math.exp %106 : vector<8x128xf32>
    %cst_23 = arith.constant 1.000000e+00 : f32
    %108 = vector.broadcast %cst_23 : f32 to vector<8x128xf32>
    %109 = arith.addf %108, %107 : vector<8x128xf32>
    %110 = arith.divf %108, %109 : vector<8x128xf32>
    %111 = vector.extract_strided_slice %102 {offsets = [0, 128], sizes = [8, 128], strides = [1, 1]} : vector<8x384xf32> to vector<8x128xf32>
    %112 = vector.extract_strided_slice %100 {offsets = [0, 128], sizes = [8, 128], strides = [1, 1]} : vector<8x384xf32> to vector<8x128xf32>
    %113 = arith.addf %111, %112 : vector<8x128xf32>
    %114 = arith.negf %113 : vector<8x128xf32>
    %115 = math.exp %114 : vector<8x128xf32>
    %cst_24 = arith.constant 1.000000e+00 : f32
    %116 = vector.broadcast %cst_24 : f32 to vector<8x128xf32>
    %117 = arith.addf %116, %115 : vector<8x128xf32>
    %118 = arith.divf %116, %117 : vector<8x128xf32>
    %119 = vector.extract_strided_slice %102 {offsets = [0, 256], sizes = [8, 128], strides = [1, 1]} : vector<8x384xf32> to vector<8x128xf32>
    %120 = vector.extract_strided_slice %100 {offsets = [0, 256], sizes = [8, 128], strides = [1, 1]} : vector<8x384xf32> to vector<8x128xf32>
    %121 = arith.addf %120, %14 : vector<8x128xf32>
    %122 = arith.mulf %110, %121 : vector<8x128xf32>
    %123 = arith.addf %119, %122 : vector<8x128xf32>
    %124 = math.tanh %123 : vector<8x128xf32>
    %125 = arith.subf %99, %124 : vector<8x128xf32>
    %126 = arith.mulf %118, %125 : vector<8x128xf32>
    %127 = arith.addf %124, %126 : vector<8x128xf32>
    %cst_25 = arith.constant dense<0.000000e+00> : vector<8x384xf32>
    %128 = tpu.matmul %127, %11, %cst_25 {dimension_numbers = #tpu.dot_dimension_numbers<[1], [0], [0], [1], [0, 0, 1, 1], [], []>} : vector<8x128xf32>, vector<128x384xf32>, vector<8x384xf32> -> vector<8x384xf32>
    %129 = vector.extract_strided_slice %10 {offsets = [4, 0, 0], sizes = [1, 8, 384], strides = [1, 1, 1]} : vector<8x8x384xf32> to vector<1x8x384xf32>
    %130 = vector.shape_cast %129 : vector<1x8x384xf32> to vector<8x384xf32>
    %131 = vector.extract_strided_slice %130 {offsets = [0, 0], sizes = [8, 128], strides = [1, 1]} : vector<8x384xf32> to vector<8x128xf32>
    %132 = vector.extract_strided_slice %128 {offsets = [0, 0], sizes = [8, 128], strides = [1, 1]} : vector<8x384xf32> to vector<8x128xf32>
    %133 = arith.addf %131, %132 : vector<8x128xf32>
    %134 = arith.negf %133 : vector<8x128xf32>
    %135 = math.exp %134 : vector<8x128xf32>
    %cst_26 = arith.constant 1.000000e+00 : f32
    %136 = vector.broadcast %cst_26 : f32 to vector<8x128xf32>
    %137 = arith.addf %136, %135 : vector<8x128xf32>
    %138 = arith.divf %136, %137 : vector<8x128xf32>
    %139 = vector.extract_strided_slice %130 {offsets = [0, 128], sizes = [8, 128], strides = [1, 1]} : vector<8x384xf32> to vector<8x128xf32>
    %140 = vector.extract_strided_slice %128 {offsets = [0, 128], sizes = [8, 128], strides = [1, 1]} : vector<8x384xf32> to vector<8x128xf32>
    %141 = arith.addf %139, %140 : vector<8x128xf32>
    %142 = arith.negf %141 : vector<8x128xf32>
    %143 = math.exp %142 : vector<8x128xf32>
    %cst_27 = arith.constant 1.000000e+00 : f32
    %144 = vector.broadcast %cst_27 : f32 to vector<8x128xf32>
    %145 = arith.addf %144, %143 : vector<8x128xf32>
    %146 = arith.divf %144, %145 : vector<8x128xf32>
    %147 = vector.extract_strided_slice %130 {offsets = [0, 256], sizes = [8, 128], strides = [1, 1]} : vector<8x384xf32> to vector<8x128xf32>
    %148 = vector.extract_strided_slice %128 {offsets = [0, 256], sizes = [8, 128], strides = [1, 1]} : vector<8x384xf32> to vector<8x128xf32>
    %149 = arith.addf %148, %14 : vector<8x128xf32>
    %150 = arith.mulf %138, %149 : vector<8x128xf32>
    %151 = arith.addf %147, %150 : vector<8x128xf32>
    %152 = math.tanh %151 : vector<8x128xf32>
    %153 = arith.subf %127, %152 : vector<8x128xf32>
    %154 = arith.mulf %146, %153 : vector<8x128xf32>
    %155 = arith.addf %152, %154 : vector<8x128xf32>
    %cst_28 = arith.constant dense<0.000000e+00> : vector<8x384xf32>
    %156 = tpu.matmul %155, %11, %cst_28 {dimension_numbers = #tpu.dot_dimension_numbers<[1], [0], [0], [1], [0, 0, 1, 1], [], []>} : vector<8x128xf32>, vector<128x384xf32>, vector<8x384xf32> -> vector<8x384xf32>
    %157 = vector.extract_strided_slice %10 {offsets = [5, 0, 0], sizes = [1, 8, 384], strides = [1, 1, 1]} : vector<8x8x384xf32> to vector<1x8x384xf32>
    %158 = vector.shape_cast %157 : vector<1x8x384xf32> to vector<8x384xf32>
    %159 = vector.extract_strided_slice %158 {offsets = [0, 0], sizes = [8, 128], strides = [1, 1]} : vector<8x384xf32> to vector<8x128xf32>
    %160 = vector.extract_strided_slice %156 {offsets = [0, 0], sizes = [8, 128], strides = [1, 1]} : vector<8x384xf32> to vector<8x128xf32>
    %161 = arith.addf %159, %160 : vector<8x128xf32>
    %162 = arith.negf %161 : vector<8x128xf32>
    %163 = math.exp %162 : vector<8x128xf32>
    %cst_29 = arith.constant 1.000000e+00 : f32
    %164 = vector.broadcast %cst_29 : f32 to vector<8x128xf32>
    %165 = arith.addf %164, %163 : vector<8x128xf32>
    %166 = arith.divf %164, %165 : vector<8x128xf32>
    %167 = vector.extract_strided_slice %158 {offsets = [0, 128], sizes = [8, 128], strides = [1, 1]} : vector<8x384xf32> to vector<8x128xf32>
    %168 = vector.extract_strided_slice %156 {offsets = [0, 128], sizes = [8, 128], strides = [1, 1]} : vector<8x384xf32> to vector<8x128xf32>
    %169 = arith.addf %167, %168 : vector<8x128xf32>
    %170 = arith.negf %169 : vector<8x128xf32>
    %171 = math.exp %170 : vector<8x128xf32>
    %cst_30 = arith.constant 1.000000e+00 : f32
    %172 = vector.broadcast %cst_30 : f32 to vector<8x128xf32>
    %173 = arith.addf %172, %171 : vector<8x128xf32>
    %174 = arith.divf %172, %173 : vector<8x128xf32>
    %175 = vector.extract_strided_slice %158 {offsets = [0, 256], sizes = [8, 128], strides = [1, 1]} : vector<8x384xf32> to vector<8x128xf32>
    %176 = vector.extract_strided_slice %156 {offsets = [0, 256], sizes = [8, 128], strides = [1, 1]} : vector<8x384xf32> to vector<8x128xf32>
    %177 = arith.addf %176, %14 : vector<8x128xf32>
    %178 = arith.mulf %166, %177 : vector<8x128xf32>
    %179 = arith.addf %175, %178 : vector<8x128xf32>
    %180 = math.tanh %179 : vector<8x128xf32>
    %181 = arith.subf %155, %180 : vector<8x128xf32>
    %182 = arith.mulf %174, %181 : vector<8x128xf32>
    %183 = arith.addf %180, %182 : vector<8x128xf32>
    %cst_31 = arith.constant dense<0.000000e+00> : vector<8x384xf32>
    %184 = tpu.matmul %183, %11, %cst_31 {dimension_numbers = #tpu.dot_dimension_numbers<[1], [0], [0], [1], [0, 0, 1, 1], [], []>} : vector<8x128xf32>, vector<128x384xf32>, vector<8x384xf32> -> vector<8x384xf32>
    %185 = vector.extract_strided_slice %10 {offsets = [6, 0, 0], sizes = [1, 8, 384], strides = [1, 1, 1]} : vector<8x8x384xf32> to vector<1x8x384xf32>
    %186 = vector.shape_cast %185 : vector<1x8x384xf32> to vector<8x384xf32>
    %187 = vector.extract_strided_slice %186 {offsets = [0, 0], sizes = [8, 128], strides = [1, 1]} : vector<8x384xf32> to vector<8x128xf32>
    %188 = vector.extract_strided_slice %184 {offsets = [0, 0], sizes = [8, 128], strides = [1, 1]} : vector<8x384xf32> to vector<8x128xf32>
    %189 = arith.addf %187, %188 : vector<8x128xf32>
    %190 = arith.negf %189 : vector<8x128xf32>
    %191 = math.exp %190 : vector<8x128xf32>
    %cst_32 = arith.constant 1.000000e+00 : f32
    %192 = vector.broadcast %cst_32 : f32 to vector<8x128xf32>
    %193 = arith.addf %192, %191 : vector<8x128xf32>
    %194 = arith.divf %192, %193 : vector<8x128xf32>
    %195 = vector.extract_strided_slice %186 {offsets = [0, 128], sizes = [8, 128], strides = [1, 1]} : vector<8x384xf32> to vector<8x128xf32>
    %196 = vector.extract_strided_slice %184 {offsets = [0, 128], sizes = [8, 128], strides = [1, 1]} : vector<8x384xf32> to vector<8x128xf32>
    %197 = arith.addf %195, %196 : vector<8x128xf32>
    %198 = arith.negf %197 : vector<8x128xf32>
    %199 = math.exp %198 : vector<8x128xf32>
    %cst_33 = arith.constant 1.000000e+00 : f32
    %200 = vector.broadcast %cst_33 : f32 to vector<8x128xf32>
    %201 = arith.addf %200, %199 : vector<8x128xf32>
    %202 = arith.divf %200, %201 : vector<8x128xf32>
    %203 = vector.extract_strided_slice %186 {offsets = [0, 256], sizes = [8, 128], strides = [1, 1]} : vector<8x384xf32> to vector<8x128xf32>
    %204 = vector.extract_strided_slice %184 {offsets = [0, 256], sizes = [8, 128], strides = [1, 1]} : vector<8x384xf32> to vector<8x128xf32>
    %205 = arith.addf %204, %14 : vector<8x128xf32>
    %206 = arith.mulf %194, %205 : vector<8x128xf32>
    %207 = arith.addf %203, %206 : vector<8x128xf32>
    %208 = math.tanh %207 : vector<8x128xf32>
    %209 = arith.subf %183, %208 : vector<8x128xf32>
    %210 = arith.mulf %202, %209 : vector<8x128xf32>
    %211 = arith.addf %208, %210 : vector<8x128xf32>
    %cst_34 = arith.constant dense<0.000000e+00> : vector<8x384xf32>
    %212 = tpu.matmul %211, %11, %cst_34 {dimension_numbers = #tpu.dot_dimension_numbers<[1], [0], [0], [1], [0, 0, 1, 1], [], []>} : vector<8x128xf32>, vector<128x384xf32>, vector<8x384xf32> -> vector<8x384xf32>
    %213 = vector.extract_strided_slice %10 {offsets = [7, 0, 0], sizes = [1, 8, 384], strides = [1, 1, 1]} : vector<8x8x384xf32> to vector<1x8x384xf32>
    %214 = vector.shape_cast %213 : vector<1x8x384xf32> to vector<8x384xf32>
    %215 = vector.extract_strided_slice %214 {offsets = [0, 0], sizes = [8, 128], strides = [1, 1]} : vector<8x384xf32> to vector<8x128xf32>
    %216 = vector.extract_strided_slice %212 {offsets = [0, 0], sizes = [8, 128], strides = [1, 1]} : vector<8x384xf32> to vector<8x128xf32>
    %217 = arith.addf %215, %216 : vector<8x128xf32>
    %218 = arith.negf %217 : vector<8x128xf32>
    %219 = math.exp %218 : vector<8x128xf32>
    %cst_35 = arith.constant 1.000000e+00 : f32
    %220 = vector.broadcast %cst_35 : f32 to vector<8x128xf32>
    %221 = arith.addf %220, %219 : vector<8x128xf32>
    %222 = arith.divf %220, %221 : vector<8x128xf32>
    %223 = vector.extract_strided_slice %214 {offsets = [0, 128], sizes = [8, 128], strides = [1, 1]} : vector<8x384xf32> to vector<8x128xf32>
    %224 = vector.extract_strided_slice %212 {offsets = [0, 128], sizes = [8, 128], strides = [1, 1]} : vector<8x384xf32> to vector<8x128xf32>
    %225 = arith.addf %223, %224 : vector<8x128xf32>
    %226 = arith.negf %225 : vector<8x128xf32>
    %227 = math.exp %226 : vector<8x128xf32>
    %cst_36 = arith.constant 1.000000e+00 : f32
    %228 = vector.broadcast %cst_36 : f32 to vector<8x128xf32>
    %229 = arith.addf %228, %227 : vector<8x128xf32>
    %230 = arith.divf %228, %229 : vector<8x128xf32>
    %231 = vector.extract_strided_slice %214 {offsets = [0, 256], sizes = [8, 128], strides = [1, 1]} : vector<8x384xf32> to vector<8x128xf32>
    %232 = vector.extract_strided_slice %212 {offsets = [0, 256], sizes = [8, 128], strides = [1, 1]} : vector<8x384xf32> to vector<8x128xf32>
    %233 = arith.addf %232, %14 : vector<8x128xf32>
    %234 = arith.mulf %222, %233 : vector<8x128xf32>
    %235 = arith.addf %231, %234 : vector<8x128xf32>
    %236 = math.tanh %235 : vector<8x128xf32>
    %237 = arith.subf %211, %236 : vector<8x128xf32>
    %238 = arith.mulf %230, %237 : vector<8x128xf32>
    %239 = arith.addf %236, %238 : vector<8x128xf32>
    %c0_37 = arith.constant 0 : index
    %c0_38 = arith.constant 0 : index
    %240 = vector.load %arg11[%c0_37, %c0_38] : memref<8x128xf32, #tpu.memory_space<vmem>>, vector<8x128xf32>
    tpu.vector_store %arg11[%c0_37, %c0_38], %239 {strides = array<i32>} : memref<8x128xf32, #tpu.memory_space<vmem>>, vector<8x128xf32>,
    %c0_39 = arith.constant 0 : index
    %c0_40 = arith.constant 0 : index
    %241 = vector.load %arg10[%c0_39, %c0_40] : memref<8x128xf32, #tpu.memory_space<vmem>>, vector<8x128xf32>
    tpu.vector_store %arg10[%c0_39, %c0_40], %239 {strides = array<i32>} : memref<8x128xf32, #tpu.memory_space<vmem>>, vector<8x128xf32>,
    %242 = tpu.concatenate %43, %71, %99, %127, %155, %183, %211, %239 in 0 : vector<8x128xf32>, vector<8x128xf32>, vector<8x128xf32>, vector<8x128xf32>, vector<8x128xf32>, vector<8x128xf32>, vector<8x128xf32>, vector<8x128xf32> -> vector<64x128xf32>
    %c0_41 = arith.constant 0 : index
    %c0_42 = arith.constant 0 : index
    %243 = vector.load %arg7[%c0_41, %c0_42] : memref<128x128xf32, #tpu.memory_space<vmem>>, vector<128x128xf32>
    %cst_43 = arith.constant dense<0.000000e+00> : vector<64x128xf32>
    %244 = tpu.matmul %242, %243, %cst_43 {dimension_numbers = #tpu.dot_dimension_numbers<[1], [0], [0], [1], [0, 0, 1, 1], [], []>} : vector<64x128xf32>, vector<128x128xf32>, vector<64x128xf32> -> vector<64x128xf32>
    %c0_44 = arith.constant 0 : index
    %c0_45 = arith.constant 0 : index
    %245 = vector.load %arg8[%c0_44, %c0_45] : memref<1x128xf32, #tpu.memory_space<vmem>>, vector<1x128xf32>
    %246 = vector.broadcast %245 : vector<1x128xf32> to vector<64x128xf32>
    %247 = arith.addf %244, %246 : vector<64x128xf32>
    %248 = vector.shape_cast %247 : vector<64x128xf32> to vector<8x8x128xf32>
    %c0_46 = arith.constant 0 : index
    %c0_47 = arith.constant 0 : index
    %c0_48 = arith.constant 0 : index
    %249 = vector.load %arg9[%c0_46, %c0_47, %c0_48] : memref<8x8x128xf32, #tpu.memory_space<vmem>>, vector<8x8x128xf32>
    tpu.vector_store %arg9[%c0_46, %c0_47, %c0_48], %248 {strides = array<i32>} : memref<8x8x128xf32, #tpu.memory_space<vmem>>, vector<8x8x128xf32>,
    return
  }
  func.func @transform_0(%arg0: i32) -> (i32, i32, i32) {
    %c0_i32 = arith.constant 0 : i32
    %c0_i32_0 = arith.constant 0 : i32
    %c0_i32_1 = arith.constant 0 : i32
    return %arg0, %c0_i32, %c0_i32_0 : i32, i32, i32
  }
  func.func @transform_1(%arg0: i32) -> (i32, i32) {
    %c0_i32 = arith.constant 0 : i32
    %c0_i32_0 = arith.constant 0 : i32
    %c0_i32_1 = arith.constant 0 : i32
    return %c0_i32, %c0_i32_0 : i32, i32
  }
  func.func @transform_2(%arg0: i32) -> (i32, i32) {
    %c0_i32 = arith.constant 0 : i32
    %c0_i32_0 = arith.constant 0 : i32
    %c0_i32_1 = arith.constant 0 : i32
    return %c0_i32, %c0_i32_0 : i32, i32
  }
  func.func @transform_3(%arg0: i32) -> (i32, i32) {
    %c0_i32 = arith.constant 0 : i32
    %c0_i32_0 = arith.constant 0 : i32
    %c0_i32_1 = arith.constant 0 : i32
    return %c0_i32, %c0_i32_0 : i32, i32
  }
  func.func @transform_4(%arg0: i32) -> (i32, i32) {
    %c0_i32 = arith.constant 0 : i32
    %c0_i32_0 = arith.constant 0 : i32
    %c0_i32_1 = arith.constant 0 : i32
    return %c0_i32, %c0_i32_0 : i32, i32
  }
  func.func @transform_5(%arg0: i32) -> (i32, i32) {
    %c0_i32 = arith.constant 0 : i32
    %c0_i32_0 = arith.constant 0 : i32
    %c0_i32_1 = arith.constant 0 : i32
    return %c0_i32, %c0_i32_0 : i32, i32
  }
  func.func @transform_6(%arg0: i32) -> (i32, i32) {
    %c0_i32 = arith.constant 0 : i32
    %c0_i32_0 = arith.constant 0 : i32
    %c0_i32_1 = arith.constant 0 : i32
    return %c0_i32, %c0_i32_0 : i32, i32
  }
  func.func @transform_7(%arg0: i32) -> (i32, i32) {
    %c0_i32 = arith.constant 0 : i32
    %c0_i32_0 = arith.constant 0 : i32
    %c0_i32_1 = arith.constant 0 : i32
    return %c0_i32, %c0_i32_0 : i32, i32
  }
  func.func @transform_8(%arg0: i32) -> (i32, i32, i32) {
    %c0_i32 = arith.constant 0 : i32
    %c0_i32_0 = arith.constant 0 : i32
    %c0_i32_1 = arith.constant 0 : i32
    return %arg0, %c0_i32, %c0_i32_0 : i32, i32, i32
  }
  func.func @transform_9(%arg0: i32) -> (i32, i32) {
    %c0_i32 = arith.constant 0 : i32
    %c0_i32_0 = arith.constant 0 : i32
    %c0_i32_1 = arith.constant 0 : i32
    return %c0_i32, %c0_i32_0 : i32, i32
  }
}

</mosaic_0001>

<bundles_post_ra>
// kernel: tpu_custom_call.1
= control target key start
LH: loop header
LB: loop body
LE: loop exit
PB: predicated region body
PF: predicated region fallthrough
CT: control target
= control target key end

     0   :  { %s4726_s0 = inlined_call_operand.hbm [shape: f32[16,8,16], index: 0, kind: input, shape index: {}]   ;;  %s4727_s1 = inlined_call_operand.hbm [shape: f32[8,128], index: 1, kind: input, shape index: {}]   ;;  %s4728_s2 = inlined_call_operand.hbm [shape: f32[16,384], index: 2, kind: input, shape index: {}]   ;;  %s4729_s3 = inlined_call_operand.vmem [shape: f32[1,384], index: 3, kind: input, shape index: {}]   ;;  %s4730_s4 = inlined_call_operand.hbm [shape: f32[128,384], index: 4, kind: input, shape index: {}]   ;;  %s4731_s5 = inlined_call_operand.vmem [shape: f32[1,128], index: 5, kind: input, shape index: {}]   ;;  %s4732_s6 = inlined_call_operand.hbm [shape: f32[128,128], index: 6, kind: input, shape index: {}]   ;;  %s4733_s7 = inlined_call_operand.vmem [shape: f32[1,128], index: 7, kind: input, shape index: {}]   ;;  %s4734_s8 = inlined_call_operand.hbm [shape: f32[16,8,128], index: 8, kind: output, shape index: {0}]   ;;  %s4735_s9 = inlined_call_operand.hbm [shape: f32[8,128], index: 9, kind: output, shape index: {1}]  }
   0x1   :  { %4740 = sst [smem:[#allocation21_spill]] %s4727_s1 }
   0x2   :  { %4741 = sst [smem:[#allocation22_spill]] %s4730_s4 }
   0x3   :  { %15 = vsyncpa [#allocation4], 0 }
   0x4   :  { %17 = vsyncpa [#allocation4 + $0x1], 0 }
   0x5   :  { %18 = vsyncpa [#allocation7], 0 }
   0x6   :  { %19 = vsyncpa [#allocation10], 0 }
   0x7   :  { %20 = vsyncpa [#allocation5], 0 }
   0x8   :  { %22 = vsyncpa [#allocation5 + $0x1], 0 }
   0x9   :  { %23 = vsyncpa [#allocation14], 0  ;;  %s3913_s30 = smov 0   ;;  %s3915_s10 = smov 0  }
   0xa   :  { %s3917_s11 = smov 0   ;;  %s3919_s12 = smov 0  }
   0xb LB: > { %s3934_s13 = sadd.s32 4294967295, %s3845_s12   ;;  %s2325_s14 = sadd.s32 4294967294, %s3845_s12   ;;  %s3845_s12 = sphi %s3919_s12, %s4771_s12   ;;  %s3841_s11 = sphi %s3917_s11, %s4770_s11   ;;  %s3837_s10 = sphi %s3915_s10, %s4769_s10   ;;  %s3833_s30 = sphi %s3913_s30, %s4768_s30  }
   0xc   : > { %p49_p0 = scmp.ne.s32.totalorder %s3837_s10, %s3833_s30  ;;  %p4736_p1 = scmp.eq.s32.totalorder %s3934_s13, 0 }
   0xd   : > { %p226_p3 = scmp.eq.s32.totalorder %s2325_s14, 1  ;;  %p2326_p5 = scmp.ge.s32.totalorder %s3845_s12, 1 }
   0xe   : > { %p3943_p4 = por %p4736_p1, %p49_p0  ;;  %p254_p7 = scmp.lt.s32.totalorder %s3845_s12, 3 }
   0xf   : > { %p3948_p6 = por %p226_p3, %p49_p0  ;;  %s3847_s18 = smov [#allocation6]  }
  0x10   : > { %s4742_s15 = scalar_select %p3943_p4, 1, 0 }
  0x11   : > { %s4743_s16 = scalar_select %p3948_p6, 1, 0 }
  0x12   : > { %p3954_p9 = pnand %p2326_p5, %p254_p7  ;;  %s267_s19 = sshll.u32 %s3847_s18, 4  ;;  %s268_s19 = int_to_ptr.vmem [resolvable:$true] %s267_s19 }
  0x13   : > { %4744 = sst [smem:[#allocation20_spill]] %s4743_s16  ;;  %s3848_s21 = smov [#allocation9]  }
  0x14   : > { %s4745_s17 = scalar_select %p3954_p9, 1, 0 }
  0x15   : > { %p3440_p11 = pneg %p3954_p9  ;;  %s293_s22 = sshll.u32 %s3848_s21, 4  ;;  %s3967_s22 = int_to_ptr.vmem [resolvable:$true] %s293_s22 }
  0x16   : > { %s3849_s23 = smov [#allocation8]   ;;  %s4747_s1 = sld [smem:[#allocation21_spill]] }
  0x17   : > { %p3963_p12 = pnand %p3440_p11, %p4736_p1  ;;  %s3969_s24 = sshll.u32 %s3849_s23, 4  ;;  %s278_s24 = int_to_ptr.vmem [resolvable:$true] %s3969_s24 }
  0x19   : > { %p3979_p0 = pneg %p3963_p12 }
  0x1c   : > { %s3599_s27 = scalar_lea.hbm %s4747_s1, 128 }
  0x1d   : > { %p3600_p13 = scmp.ne.s32.totalorder %s4747_s1, %s3599_s27  ;;  %p3606_p7 = scmp.lt.u32.totalorder %s3599_s27, %s4747_s1 }
  0x1f   : > { %p3602_p3 = pnand %p3979_p0, %p3600_p13 }
  0x21   : > { %p3603_p5 = pneg %p3602_p3 }
  0x23   : > { %p3608_p11 = pnand %p3606_p7, %p3603_p5 }
  0x25   : > { %3611 = shalt.err (!%p3608_p11)
}
  0x26   : > { %s3612_s23 = scalar_lea.vmem %s268_s19, 128  ;;  %p3620_p2 = scmp.lt.s32.totalorder %s268_s19, %s268_s19 }
  0x27   : > { %p3613_p10 = scmp.ne.s32.totalorder %s268_s19, %s3612_s23  ;;  %p3621_p6 = scmp.lt.s32.totalorder %s3612_s23, %s3612_s23 }
  0x29   : > { %p3615_p8 = pnand %p3613_p10, %p3979_p0  ;;  %p3622_p4 = por %p3621_p6, %p3620_p2 }
  0x2b   : > { %p3616_p1 = pneg %p3615_p8 }
  0x2d   : > { %p3623_p9 = pnand %p3622_p4, %p3616_p1 }
  0x2f   : > { %3626 = shalt.err (!%p3623_p9)
}
  0x30   : > { %3443 = dma.hbm_to_vmem [thread:$0]  (!%p3963_p12), %s4747_s1, 128, %s268_s19, [#allocation7]  }
  0x31   : > { %s4749_s4 = sld [smem:[#allocation22_spill]] }
  0x37   : > { %s3627_s29 = scalar_lea.hbm %s4749_s4, 6144 }
  0x38   : > { %p3628_p8 = scmp.ne.s32.totalorder %s4749_s4, %s3627_s29  ;;  %p3634_p1 = scmp.lt.u32.totalorder %s3627_s29, %s4749_s4 }
  0x3a   : > { %p3630_p10 = pnand %p3628_p8, %p3979_p0 }
  0x3c   : > { %p3631_p2 = pneg %p3630_p10 }
  0x3e   : > { %p3636_p4 = pnand %p3634_p1, %p3631_p2 }
  0x40   : > { %3639 = shalt.err (!%p3636_p4)
}
  0x41   : > { %s3640_s19 = scalar_lea.vmem %s3967_s22, 6144  ;;  %p3648_p3 = scmp.lt.s32.totalorder %s3967_s22, %s3967_s22 }
  0x42   : > { %p3641_p6 = scmp.ne.s32.totalorder %s3967_s22, %s3640_s19  ;;  %p3649_p5 = scmp.lt.s32.totalorder %s3640_s19, %s3640_s19 }
  0x44   : > { %p3643_p9 = pnand %p3641_p6, %p3979_p0  ;;  %p3650_p7 = por %p3649_p5, %p3648_p3 }
  0x46   : > { %p3644_p13 = pneg %p3643_p9 }
  0x48   : > { %p3651_p11 = pnand %p3650_p7, %p3644_p13 }
  0x4a   : > { %3654 = shalt.err (!%p3651_p11)
}
  0x4b   : > { %s3850_s25 = smov 384   ;;  %s3851_s16 = smov 24  }
  0x4c   : > { %3449 = dma.hbm_to_vmem [thread:$0]  (!%p3963_p12), %s4749_s4, 6144, %s3967_s22, [#allocation10], %s3850_s25, %s3850_s25, %s3851_s16  }
  0x4d   : > { %s3655_s18 = scalar_lea.hbm %s4728_s2, 768 }
  0x4e   : > { %p3656_p8 = scmp.ne.s32.totalorder %s4728_s2, %s3655_s18  ;;  %p3662_p1 = scmp.lt.u32.totalorder %s3655_s18, %s4728_s2 }
  0x50   : > { %p3658_p10 = pnand %p3656_p8, %p3979_p0 }
  0x52   : > { %p3659_p2 = pneg %p3658_p10 }
  0x54   : > { %p3664_p4 = pnand %p3662_p1, %p3659_p2 }
  0x56   : > { %3667 = shalt.err (!%p3664_p4)
}
  0x57   : > { %s3668_s26 = scalar_lea.vmem %s278_s24, 768  ;;  %p3676_p3 = scmp.lt.s32.totalorder %s278_s24, %s278_s24 }
  0x58   : > { %p3669_p6 = scmp.ne.s32.totalorder %s278_s24, %s3668_s26  ;;  %p3677_p5 = scmp.lt.s32.totalorder %s3668_s26, %s3668_s26 }
  0x5a   : > { %p3671_p9 = pnand %p3669_p6, %p3979_p0  ;;  %p3678_p7 = por %p3677_p5, %p3676_p3 }
  0x5c   : > { %p3672_p13 = pneg %p3671_p9 }
  0x5e   : > { %p3679_p11 = pnand %p3678_p7, %p3672_p13 }
  0x60   : > { %3682 = shalt.err (!%p3679_p11)
}
  0x61   : > { %3446 = dma.hbm_to_vmem [thread:$0]  (!%p3963_p12), %s4728_s2, 768, %s278_s24, [#allocation7], %s3850_s25, %s3850_s25, %s3851_s16  }
  0x62   : > { %s3852_s1 = smov [#allocation11]   ;;  %s3683_s21 = scalar_lea.hbm %s4732_s6, 2048 }
  0x63   : > { %s309_s28 = sshll.u32 %s3852_s1, 4  ;;  %p3684_p8 = scmp.ne.s32.totalorder %s4732_s6, %s3683_s21  ;;  %s310_s28 = int_to_ptr.vmem [resolvable:$true] %s309_s28 }
  0x64   : > { %p3690_p1 = scmp.lt.u32.totalorder %s3683_s21, %s4732_s6 }
  0x65   : > { %p3686_p10 = pnand %p3684_p8, %p3979_p0 }
  0x67   : > { %p3687_p2 = pneg %p3686_p10 }
  0x69   : > { %p3692_p4 = pnand %p3690_p1, %p3687_p2 }
  0x6b   : > { %3695 = shalt.err (!%p3692_p4)
}
  0x6c   : > { %s3696_s24 = scalar_lea.vmem %s310_s28, 2048  ;;  %p3704_p3 = scmp.lt.s32.totalorder %s310_s28, %s310_s28 }
  0x6d   : > { %p3697_p6 = scmp.ne.s32.totalorder %s310_s28, %s3696_s24  ;;  %p3705_p5 = scmp.lt.s32.totalorder %s3696_s24, %s3696_s24 }
  0x6f   : > { %p3699_p9 = pnand %p3697_p6, %p3979_p0  ;;  %p3706_p7 = por %p3705_p5, %p3704_p3 }
  0x71   : > { %p3700_p13 = pneg %p3699_p9 }
  0x73   : > { %p3707_p11 = pnand %p3706_p7, %p3700_p13 }
  0x75   : > { %3710 = shalt.err (!%p3707_p11)
}
  0x76   : > { %s3853_s25 = smov 128   ;;  %s3854_s4 = smov 8  }
  0x77   : > { %3452 = dma.hbm_to_vmem [thread:$0]  (!%p3963_p12), %s4732_s6, 2048, %s310_s28, [#allocation10], %s3853_s25, %s3853_s25, %s3854_s4  }
  0x78   : > { %s4059_s22 = sadd.s32 1, %s3845_s12   ;;  %s36_s1 = sadd.s32 1, %s3841_s11 }
  0x79   : > { %s33_s27 = ssub.s32 %s3845_s12, %s4059_s22  ;;  %p43_p8 = scmp.ne.s32.totalorder %s3841_s11, %s3837_s10 }
  0x7a   : > { %p34_p0 = scmp.eq.s32.totalorder %s33_s27, 0  ;;  %p44_p10 = scmp.eq.s32.totalorder %s3845_s12, 0 }
  0x7b   : > { %p4750_p1 = scmp.eq.s32.totalorder %s3934_s13, 1  ;;  %p3465_p6 = scmp.lt.s32.totalorder %s3845_s12, 2 }
  0x7c   : > { %s4068_s29 = scalar_select %p34_p0, %s3841_s11, %s36_s1  }
  0x7d   : > { %p45_p2 = por %p44_p10, %p43_p8  ;;  %p4072_p4 = por %p4750_p1, %p43_p8 }
  0x7e   : > { %s326_s18 = sand.u32 1, %s3841_s11   ;;  %s2384_s28 = sshll.u32 %s3845_s12, 10 }
  0x7f   : > { %s2332_s21 = sshll.u32 %s326_s18, 6  ;;  %s4082_s26 = scalar_lea.hbm %s4726_s0, %s2384_s28 }
  0x80   : > { %s330_s24 = scalar_lea.vmem [#allocation3], %s2332_s21  ;;  %p4086_p12 = pnand %p3465_p6, %p45_p2 }
  0x81   : > { %s337_s14 = sshll.u32 %s330_s24, 4  ;;  %s4090_s27 = scalar_lea.sflag [#allocation4], %s326_s18  ;;  %s4084_s14 = int_to_ptr.vmem [resolvable:$true] %s337_s14 }
  0x82   : > { %s3711_s1 = scalar_lea.hbm %s4082_s26, 1024  ;;  %p3713_p13 = pneg %p4086_p12 }
  0x83   : > { %p3712_p9 = scmp.ne.s32.totalorder %s4082_s26, %s3711_s1  ;;  %s3716_s23 = scalar_lea.hbm %s4726_s0, 2048 }
  0x84   : > { %p3717_p7 = scmp.lt.u32.totalorder %s4082_s26, %s4726_s0  ;;  %p3718_p11 = scmp.lt.u32.totalorder %s3716_s23, %s3711_s1 }
  0x85   : > { %p3714_p3 = pnand %p3713_p13, %p3712_p9  ;;  %p3720_p8 = scmp.lt.u32.totalorder %s3711_s1, %s4082_s26 }
  0x86   : > { %p3719_p0 = por %p3718_p11, %p3717_p7 }
  0x87   : > { %p3715_p5 = pneg %p3714_p3 }
  0x88   : > { %p3721_p10 = por %p3720_p8, %p3719_p0 }
  0x8a   : > { %p3722_p2 = pnand %p3721_p10, %p3715_p5 }
  0x8c   : > { %3725 = shalt.err (!%p3722_p2)
}
  0x8d   : > { %s3726_s18 = scalar_lea.vmem %s4084_s14, 1024  ;;  %s3855_s21 = smov [#allocation3]  }
  0x8e   : > { %p3727_p1 = scmp.ne.s32.totalorder %s4084_s14, %s3726_s18  ;;  %s3731_s28 = sshll.u32 %s3855_s21, 4  ;;  %s3732_s28 = int_to_ptr.vmem [resolvable:$false] %s3731_s28 }
  0x8f   : > { %s3733_s19 = scalar_lea.vmem %s3732_s28, 2048  ;;  %p3734_p3 = scmp.lt.s32.totalorder %s4084_s14, %s3732_s28 }
  0x90   : > { %p3729_p6 = pnand %p3727_p1, %p3713_p13  ;;  %p3735_p7 = scmp.lt.s32.totalorder %s3733_s19, %s3726_s18 }
  0x92   : > { %p3730_p9 = pneg %p3729_p6  ;;  %p3736_p11 = por %p3735_p7, %p3734_p3 }
  0x94   : > { %p3737_p0 = pnand %p3736_p11, %p3730_p9 }
  0x96   : > { %3740 = shalt.err (!%p3737_p0)
}
  0x97   : > { %3456 = dma.hbm_to_vmem [thread:$0]  (!%p4086_p12), %s4082_s26, 1024, %s4084_s14, %s4090_s27, %s3853_s25, %s3853_s25, %s3854_s4  }
  0x98   : > { %p4753_p13 = scmp.ne.s32.totalorder %s4745_s17, 0 }
  0x99   : > { %s4124_s1 = sand.u32 (!%p4753_p13), 1, %s3837_s10   ;;  %p4754_p5 = scmp.ne.s32.totalorder (!%p4753_p13), %s4742_s15, 0 }
  0x9a   : > { %349 = sbr.rel (%p4753_p13) target bundleno = 2546 (0x9f2), region = 52  ;;  %s2336_s23 = sshll.u32 (!%p4753_p13), %s4124_s1, 6 }
  0x9b   : > { %s352_s24 = scalar_lea.sflag (!%p4753_p13), [#allocation4], %s4124_s1  ;;  %s4128_s18 = scalar_lea.vmem (!%p4753_p13), [#allocation3], %s2336_s23 }
  0xa1   : > { %3812 = dma.done.wait (%p4754_p5), %s352_s24, 1024  }
  0xa2   : > { %3814 = vsyncadd (%p4754_p5), %s352_s24, 4294966272  ;;  %p4755_p12 = scmp.eq.s32.totalorder %s3934_s13, 0 }
  0xa4   : > { %3816 = dma.done.wait (%p4755_p12), [#allocation7], 896   ;;  %p4756_p8 = pmov %p4755_p12 }
  0xa6   : > { %3818 = vsyncadd (%p4756_p8), [#allocation7], 4294966400  ;;  %p4757_p10 = pmov %p4756_p8 }
  0xa7   : > { %p4758_p2 = pmov %p4756_p8 }
  0xa8   : > { %3820 = dma.done.wait (%p4757_p10), [#allocation10], 8192  }
  0xa9   : > { %3822 = vsyncadd (%p4758_p2), [#allocation10], 4294959104  ;;  %s4142_s17 = scalar_lea.vmem [#allocation12], %s2336_s23  ;;  %p4759_p1 = scmp.ne.s32.totalorder %s3934_s13, 0 }
  0xaa   : > { %v412_v0 = vld [vmem:[#allocation6] sm:$0xff] (!%p4759_p1) }
  0xab   : > { %411 = sbr.rel (%p4759_p1) target bundleno = 178 (0xb2), region = 76  ;;  %413 = vst [vmem:[#allocation2] sm:$0xff] (!%p4759_p1), %v412_v0 }
  0xb2 PF: > { %v424_v1 = vld [vmem:[#allocation8 + $0x10] sm:$0xff]  ;;  %v427_v2 = vld [vmem:[#allocation8 + $0x28] sm:$0xff]  ;;  %v4147_v3 = vld [vmem:[%s4128_s18] sm:$0xff]  ;;  %vm445_vm0 = vcmask 130048   ;;  %v3856_v7 = vmov 0.0   ;;  %vm3858_vm1 = vmmov 0  }
  0xb3   : > { %v2900_v4 = vpack.c.bf16 %v427_v2, %v424_v1  ;;  %2560 = vmatprep.mubr.msk.f32.mxu1 %vm445_vm0, %v4147_v3  ;;  %v689_v5 = vld [vmem:[#allocation9 + $0x8] sm:$0xff]  ;;  %v692_v6 = vld [vmem:[#allocation9 + $0x20] sm:$0xff]  ;;  %534 = vmatprep.mubr.f32.mxu0 %v3856_v7  ;;  %v691_v10 = vld [vmem:[#allocation9 + $0x18] sm:$0xff]  ;;  %s3859_s27 = smov [#allocation13]   ;;  %p4760_p9 = scmp.eq.s32.totalorder %s3934_s13, 1 }
  0xb4   : > { %v4152_v8 = vpack.c.bf16 %v692_v6, %v689_v5  ;;  %v688_v9 = vld [vmem:[#allocation9] sm:$0xff]  ;;  %v695_v11 = vld [vmem:[#allocation9 + $0x38] sm:$0xff]  ;;  %v698_v12 = vld [vmem:[#allocation9 + $0x50] sm:$0xff]  ;;  %s2206_s21 = sshll.u32 %s3859_s27, 4  ;;  %s2207_s21 = int_to_ptr.vmem [resolvable:$true] %s2206_s21 }
  0xb5   : > { %2901 = vmatprep.subr.bf16.mxu1 %v2900_v4  ;;  %v4155_v13 = vld [vmem:[%s4128_s18 + $0x8] sm:$0xff]  ;;  %v4157_v14 = vpack.c.bf16 %v691_v10, %v688_v9  ;;  %v4160_v15 = vpack.c.bf16 %v698_v12, %v695_v11  ;;  %v697_v17 = vld [vmem:[#allocation9 + $0x48] sm:$0xff]  ;;  %v704_v19 = vld [vmem:[#allocation9 + $0x80] sm:$0xff]  ;;  %v3857_v9 = vmov 0.0|0.0   ;;  %s3741_s28 = scalar_lea.vmem %s2207_s21, 128  ;;  %p3748_p11 = scmp.lt.s32.totalorder %s2207_s21, %s2207_s21 }
  0xb6   : > { %2903 = vmatpush3.bf16.msra.mxu1 %v2900_v4  ;;  %v694_v16 = vld [vmem:[#allocation9 + $0x30] sm:$0xff]  ;;  %v701_v18 = vld [vmem:[#allocation9 + $0x68] sm:$0xff]  ;;  %v4168_v21 = vld [vmem:[%s4128_s18 + $0x10] sm:$0xff]  ;;  %p3742_p6 = scmp.ne.s32.totalorder %s2207_s21, %s3741_s28  ;;  %p3749_p0 = scmp.lt.s32.totalorder %s3741_s28, %s3741_s28 }
  0xb7   : > { %2905 = vmatprep.subr.bf16.mxu1 %v4152_v8  ;;  %v4165_v20 = vpack.c.bf16 %v697_v17, %v694_v16  ;;  %v4171_v22 = vld [vmem:[%s4128_s18 + $0x18] sm:$0xff]  ;;  %v4174_v23 = vpack.c.bf16 %v704_v19, %v701_v18  ;;  %v703_v25 = vld [vmem:[#allocation9 + $0x78] sm:$0xff]  ;;  %v710_v27 = vld [vmem:[#allocation9 + $0xb0] sm:$0xff] }
  0xb8   : > { %v700_v24 = vld [vmem:[#allocation9 + $0x60] sm:$0xff]  ;;  %v707_v26 = vld [vmem:[#allocation9 + $0x98] sm:$0xff]  ;;  %v4179_v28 = vld [vmem:[%s4128_s18 + $0x20] sm:$0xff]  ;;  %p3743_p3 = pnand %p3742_p6, %p4760_p9  ;;  %p3750_p13 = por %p3749_p0, %p3748_p11 }
  0xb9   : > { %2561 = vmatmul.mubr.msk.f32.vlgmr.msra.gmra.mrb[0].mxu1 %vm445_vm0, %v4155_v13  ;;  %v4184_v29 = vld [vmem:[%s4128_s18 + $0x28] sm:$0xff]  ;;  %v4187_v30 = vpack.c.bf16 %v703_v25, %v700_v24  ;;  %v423_v31 = vld [vmem:[#allocation8 + $0x8] sm:$0xff]  ;;  %v4192_v34 = vpack.c.bf16 %v710_v27, %v707_v26  ;;  %v709_v36 = vld [vmem:[#allocation9 + $0xa8] sm:$0xff] }
  0xba   : > { %2907 = vmatpush1.bf16.msra.mxu1 %v4157_v14  ;;  %2563 = vmatprep.mubr.msk.f32.mxu1 %vm445_vm0, %v4168_v21  ;;  %v426_v32 = vld [vmem:[#allocation8 + $0x20] sm:$0xff]  ;;  %v425_v38 = vld [vmem:[#allocation8 + $0x18] sm:$0xff]  ;;  %v716_v40 = vld [vmem:[#allocation9 + $0xe0] sm:$0xff]  ;;  %p3744_p7 = pneg %p3743_p3 }
  0xbb   : > { %2909 = vmatprep.subr.bf16.mxu1 %v4160_v15  ;;  %v422_v33 = vld [vmem:[#allocation8] sm:$0xff]  ;;  %v2896_v37 = vpack.c.bf16 %v426_v32, %v423_v31  ;;  %v713_v39 = vld [vmem:[#allocation9 + $0xc8] sm:$0xff]  ;;  %v4195_v42 = vld [vmem:[%s4128_s18 + $0x30] sm:$0xff] }
  0xbc   : > { %v706_v35 = vld [vmem:[#allocation9 + $0x90] sm:$0xff]  ;;  %v2898_v41 = vpack.c.bf16 %v425_v38, %v422_v33  ;;  %v4203_v44 = vld [vmem:[%s4128_s18 + $0x38] sm:$0xff]  ;;  %v4206_v45 = vpack.c.bf16 %v716_v40, %v713_v39  ;;  %v715_v47 = vld [vmem:[#allocation9 + $0xd8] sm:$0xff]  ;;  %p3751_p5 = pnand %p3750_p13, %p3744_p7 }
  0xbd   : > { %2564 = vmatmul.mubr.msk.f32.gmra.mrb[2].mxu1 %vm445_vm0, %v4171_v22  ;;  %2897 = vmatprep.subr.bf16.mxu0 %v2896_v37  ;;  %v4200_v43 = vpack.c.bf16 %v709_v36, %v706_v35  ;;  %v712_v46 = vld [vmem:[#allocation9 + $0xc0] sm:$0xff]  ;;  %v719_v48 = vld [vmem:[#allocation9 + $0xf8] sm:$0xff]  ;;  %v722_v49 = vld [vmem:[#allocation9 + $0x110] sm:$0xff]  ;;  %v430_v37 = vlaneseq }
  0xbe   : > { %2911 = vmatpush1.bf16.msra.mxu1 %v4165_v20  ;;  %2566 = vmatprep.mubr.msk.f32.mxu1 %vm445_vm0, %v4179_v28  ;;  %v4216_v50 = vpack.c.bf16 %v715_v47, %v712_v46  ;;  %v4220_v51 = vpack.c.bf16 %v722_v49, %v719_v48  ;;  %v718_v52 = vld [vmem:[#allocation9 + $0xf0] sm:$0xff]  ;;  %v721_v53 = vld [vmem:[#allocation9 + $0x108] sm:$0xff]  ;;  %v728_v55 = vld [vmem:[#allocation9 + $0x140] sm:$0xff] }
  0xbf   : > { %2913 = vmatprep.subr.bf16.mxu1 %v4174_v23  ;;  %2899 = vmatpush1.bf16.msra.mxu0 %v2898_v41  ;;  %v725_v54 = vld [vmem:[#allocation9 + $0x128] sm:$0xff]  ;;  %v4228_v56 = vpack.c.bf16 %v721_v53, %v718_v52  ;;  %v724_v58 = vld [vmem:[#allocation9 + $0x120] sm:$0xff]  ;;  %v727_v59 = vld [vmem:[#allocation9 + $0x138] sm:$0xff]  ;;  %v431_v38 = vshrl.u32 %v430_v37, 7 }
  0xc0   : > { %2961 = vmatprep.subr.bf16.mxu0 %v4152_v8  ;;  %v4232_v57 = vpack.c.bf16 %v728_v55, %v725_v54  ;;  %v731_v60 = vld [vmem:[#allocation9 + $0x158] sm:$0xff]  ;;  %v734_v61 = vld [vmem:[#allocation9 + $0x170] sm:$0xff]  ;;  %v4239_v62 = vpack.c.bf16 %v727_v59, %v724_v58  ;;  %v733_v1 = vld [vmem:[#allocation9 + $0x168] sm:$0xff] }
  0xc1   : > { %2567 = vmatmul.mubr.msk.f32.gmra.mrb[4].mxu1 %vm445_vm0, %v4184_v29  ;;  %v4243_v63 = vpack.c.bf16 %v734_v61, %v731_v60  ;;  %v730_v0 = vld [vmem:[#allocation9 + $0x150] sm:$0xff]  ;;  %v693_v4 = vld [vmem:[#allocation9 + $0x28] sm:$0xff]  ;;  %v4259_v5 = vld [vmem:[#allocation2] sm:$0xff]  ;;  %v440_v39 = vsub.s32 2, %v431_v38 }
  0xc2   : > { %2915 = vmatpush1.bf16.msra.mxu1 %v4187_v30  ;;  %2569 = vmatprep.mubr.msk.f32.mxu1 %vm445_vm0, %v4195_v42  ;;  %v4250_v2 = vpack.c.bf16 %v733_v1, %v730_v0  ;;  %v696_v10 = vld [vmem:[#allocation9 + $0x40] sm:$0xff]  ;;  %v699_v11 = vld [vmem:[#allocation9 + $0x58] sm:$0xff]  ;;  %v705_v16 = vld [vmem:[#allocation9 + $0x88] sm:$0xff] }
  0xc3   : > { %2917 = vmatprep.subr.bf16.mxu1 %v4192_v34  ;;  %2343 = vmatmul.mubr.msk.f32.vlgmr.msra.gmra.mrb[0].mxu0 %vm445_vm0, %v4147_v3  ;;  %v690_v3 = vld [vmem:[#allocation9 + $0x10] sm:$0xff]  ;;  %v4271_v12 = vpack.c.bf16 %v699_v11, %v696_v10  ;;  %v708_v18 = vld [vmem:[#allocation9 + $0xa0] sm:$0xff]  ;;  %v711_v19 = vld [vmem:[#allocation9 + $0xb8] sm:$0xff]  ;;  %v436_v10 = vsub.s32 1, %v431_v38 }
  0xc4   : > { %2963 = vmatpush1.bf16.msra.mxu0 %v4157_v14  ;;  %540 = vmatprep.mubr.f32.mxu0 %v3856_v7  ;;  %v4261_v6 = vpack.c.bf16 %v693_v4, %v690_v3  ;;  %v717_v24 = vld [vmem:[#allocation9 + $0xe8] sm:$0xff]  ;;  %v720_v26 = vld [vmem:[#allocation9 + $0x100] sm:$0xff]  ;;  %v723_v27 = vld [vmem:[#allocation9 + $0x118] sm:$0xff]  ;;  %v432_v4 = vsub.s32 0, %v431_v38 }
  0xc5   : > { %2570 = vmatmul.mubr.msk.f32.gmra.mrb[6].mxu1 %vm445_vm0, %v4203_v44  ;;  %2965 = vmatprep.subr.bf16.mxu0 %v4160_v15  ;;  %v729_v31 = vld [vmem:[#allocation9 + $0x148] sm:$0xff]  ;;  %v732_v33 = vld [vmem:[#allocation9 + $0x160] sm:$0xff]  ;;  %v735_v35 = vld [vmem:[#allocation9 + $0x178] sm:$0xff] }
  0xc6   : > { %2919 = vmatpush1.bf16.msra.mxu1 %v4200_v43  ;;  %808 = vmatprep.mubr.f32.mxu1 %v3856_v7  ;;  %v4310_v36 = vpack.c.bf16 %v735_v35, %v732_v33  ;;  %v428_v40 = vld [vmem:[%s4729_s3] sm:$0x7] }
  0xc7   : > { %2921 = vmatprep.subr.bf16.mxu1 %v4206_v45  ;;  %2344 = vmatmul.mubr.msk.f32.gmra.mrb[2].mxu0 %vm445_vm0, %v4155_v13  ;;  %v702_v13 = vld [vmem:[#allocation9 + $0x70] sm:$0xff]  ;;  %v441_v41 = vrot.slane %v428_v40, %v440_v39  ;;  %v4351_v11 = vrot.slane %v428_v40, %v432_v4  ;;  %v4360_v35 = vld [vmem:[%s4731_s5] ss:$0 sm:$0xff] }
  0xc8   : > { %546 = vmatprep.mubr.f32.mxu0 %v3856_v7  ;;  %2967 = vmatpush1.bf16.msra.mxu0 %v4165_v20  ;;  %v4282_v17 = vpack.c.bf16 %v705_v16, %v702_v13  ;;  %v4353_v13 = vrot.slane %v428_v40, %v436_v10 }
  0xc9   : > { %2969 = vmatprep.subr.bf16.mxu0 %v4174_v23 }
  0xca   : > { %2923 = vmatpush1.bf16.msra.mxu1 %v4216_v50 }
  0xcb   : > { %2925 = vmatprep.subr.bf16.mxu1 %v4220_v51  ;;  %2345 = vmatmul.mubr.msk.f32.gmra.mrb[4].mxu0 %vm445_vm0, %v4168_v21  ;;  %v4291_v21 = vpack.c.bf16 %v711_v19, %v708_v18 }
  0xcc   : > { %552 = vmatprep.mubr.f32.mxu0 %v3856_v7  ;;  %2971 = vmatpush1.bf16.msra.mxu0 %v4187_v30 }
  0xcd   : > { %2973 = vmatprep.subr.bf16.mxu0 %v4192_v34 }
  0xce   : > { %2927 = vmatpush1.bf16.msra.mxu1 %v4228_v56 }
  0xcf   : > { %2929 = vmatprep.subr.bf16.mxu1 %v4232_v57  ;;  %2346 = vmatmul.mubr.msk.f32.gmra.mrb[6].mxu0 %vm445_vm0, %v4171_v22  ;;  %v714_v22 = vld [vmem:[#allocation9 + $0xd0] sm:$0xff] }
  0xd0   : > { %558 = vmatprep.mubr.f32.mxu0 %v3856_v7  ;;  %2975 = vmatpush1.bf16.msra.mxu0 %v4200_v43  ;;  %v4298_v25 = vpack.c.bf16 %v717_v24, %v714_v22 }
  0xd1   : > { %2977 = vmatprep.subr.bf16.mxu0 %v4206_v45 }
  0xd2   : > { %2931 = vmatpush1.bf16.msra.mxu1 %v4239_v62 }
  0xd3   : > { %2933 = vmatprep.subr.bf16.mxu1 %v4243_v63  ;;  %2347 = vmatmul.mubr.msk.f32.gmra.mrb[8].mxu0 %vm445_vm0, %v4179_v28  ;;  %v4302_v28 = vpack.c.bf16 %v723_v27, %v720_v26 }
  0xd4   : > { %564 = vmatprep.mubr.f32.mxu0 %v3856_v7  ;;  %2979 = vmatpush1.bf16.msra.mxu0 %v4216_v50 }
  0xd5   : > { %2981 = vmatprep.subr.bf16.mxu0 %v4220_v51 }
  0xd6   : > { %2935 = vmatpush1.bf16.msra.mxu1 %v4250_v2 }
  0xd7   : > { %2936 = vmatprep.subr.bf16.mxu1 %v3857_v9  ;;  %2348 = vmatmul.mubr.msk.f32.gmra.mrb[10].mxu0 %vm445_vm0, %v4184_v29  ;;  %v726_v29 = vld [vmem:[#allocation9 + $0x130] sm:$0xff] }
  0xd8   : > { %2983 = vmatpush1.bf16.msra.mxu0 %v4228_v56  ;;  %570 = vmatprep.mubr.f32.mxu0 %v3856_v7  ;;  %v4306_v32 = vpack.c.bf16 %v729_v31, %v726_v29 }
  0xd9   : > { %809 = vmatmul.mubr.f32.vlgmr.msra.gmra.mrb[8].mxu1 %v4259_v5  ;;  %2985 = vmatprep.subr.bf16.mxu0 %v4232_v57 }
  0xda   : > { %2938 = vmatpush3.bf16.msra.mxu1 %v4261_v6  ;;  %2604 = vmatprep.mubr.msk.f32.mxu1 %vm3858_vm1, %v3856_v7 }
  0xdb   : > { %2939 = vmatprep.subr.bf16.mxu1 %v3857_v9  ;;  %2349 = vmatmul.mubr.msk.f32.gmra.mrb[12].mxu0 %vm445_vm0, %v4195_v42 }
  0xdc   : > { %576 = vmatprep.mubr.f32.mxu0 %v3856_v7  ;;  %2987 = vmatpush1.bf16.msra.mxu0 %v4239_v62 }
  0xdd   : > { %2989 = vmatprep.subr.bf16.mxu0 %v4243_v63 }
  0xde   : > { %2941 = vmatpush3.bf16.msra.mxu1 %v4271_v12 }
  0xdf   : > { %2942 = vmatprep.subr.bf16.mxu1 %v3857_v9  ;;  %2350 = vmatmul.mubr.msk.f32.gmra.mrb[14].mxu0 %vm445_vm0, %v4203_v44 }
  0xe0   : > { %970 = vmatprep.mubr.f32.mxu0 %v3856_v7  ;;  %2991 = vmatpush1.bf16.msra.mxu0 %v4250_v2 }
  0xe1   : > { %3017 = vmatprep.subr.bf16.mxu0 %v4152_v8 }
  0xe2   : > { %2944 = vmatpush3.bf16.msra.mxu1 %v4282_v17 }
  0xe3   : > { %2945 = vmatprep.subr.bf16.mxu1 %v3857_v9 }
  0xe6   : > { %2947 = vmatpush3.bf16.msra.mxu1 %v4291_v21 }
  0xe7   : > { %2948 = vmatprep.subr.bf16.mxu1 %v3857_v9 }
  0xea   : > { %2950 = vmatpush3.bf16.msra.mxu1 %v4298_v25 }
  0xeb   : > { %2951 = vmatprep.subr.bf16.mxu1 %v3857_v9 }
  0xee   : > { %2953 = vmatpush3.bf16.msra.mxu1 %v4302_v28 }
  0xef   : > { %2954 = vmatprep.subr.bf16.mxu1 %v3857_v9 }
  0xf2   : > { %2956 = vmatpush3.bf16.msra.mxu1 %v4306_v32 }
  0xf3   : > { %2957 = vmatprep.subr.bf16.mxu1 %v3857_v9 }
  0xf6   : > { %2959 = vmatpush3.bf16.msra.mxu1 %v4310_v36 }
  0xf7   : > { %2992 = vmatprep.subr.bf16.mxu1 %v3857_v9 }
  0xf9   : > { %2605 = vmatmul.mubr.f32.vlgmr.msra.gmra.mrb[10].mxu1 %v4259_v5 }
  0xfa   : > { %2994 = vmatpush3.bf16.msra.mxu1 %v4261_v6  ;;  %2639 = vmatprep.mubr.msk.f32.mxu1 %vm3858_vm1, %v3856_v7 }
  0xfb   : > { %2995 = vmatprep.subr.bf16.mxu1 %v3857_v9 }
  0xfe   : > { %2997 = vmatpush3.bf16.msra.mxu1 %v4271_v12 }
  0xff   : > { %2998 = vmatprep.subr.bf16.mxu1 %v3857_v9 }
 0x102   : > { %3000 = vmatpush3.bf16.msra.mxu1 %v4282_v17 }
 0x103   : > { %3001 = vmatprep.subr.bf16.mxu1 %v3857_v9 }
 0x106   : > { %3003 = vmatpush3.bf16.msra.mxu1 %v4291_v21 }
 0x107   : > { %3004 = vmatprep.subr.bf16.mxu1 %v3857_v9 }
 0x10a   : > { %3006 = vmatpush3.bf16.msra.mxu1 %v4298_v25 }
 0x10b   : > { %3007 = vmatprep.subr.bf16.mxu1 %v3857_v9 }
 0x10e   : > { %3009 = vmatpush3.bf16.msra.mxu1 %v4302_v28 }
 0x10f   : > { %3010 = vmatprep.subr.bf16.mxu1 %v3857_v9 }
 0x112   : > { %3012 = vmatpush3.bf16.msra.mxu1 %v4306_v32 }
 0x113   : > { %3013 = vmatprep.subr.bf16.mxu1 %v3857_v9 }
 0x116   : > { %3015 = vmatpush3.bf16.msra.mxu1 %v4310_v36 }
 0x117   : > { %3048 = vmatprep.subr.bf16.mxu1 %v3857_v9 }
 0x18c   : > { %v2562_v42 = vpop.f32.mrb[0].mxu1 }
 0x18d   : > { %v4337_v44 = vadd.f32 %v2562_v42, %v441_v41  ;;  %v649_v46 = vpop.f32.mrb[1].mxu1 }
 0x190   : > { %v2565_v47 = vpop.f32.mrb[2].mxu1 }
 0x191   : > { %v4339_v48 = vadd.f32 %v2565_v47, %v441_v41  ;;  %v659_v49 = vpop.f32.mrb[3].mxu1  ;;  %v650_v47 = vadd.f32 %v649_v46, %v441_v41 }
 0x192   : > { %v4341_v52 = vadd.f32 %v659_v49, %v441_v41 }
 0x194   : > { %v2568_v53 = vpop.f32.mrb[4].mxu1 }
 0x195   : > { %v4343_v54 = vadd.f32 %v2568_v53, %v441_v41  ;;  %v669_v55 = vpop.f32.mrb[5].mxu1 }
 0x196   : > { %v4345_v58 = vadd.f32 %v669_v55, %v441_v41  ;;  %v536_v60 = vpop.f32.mrb[0].mxu0 }
 0x197   : > { %v538_v1 = vpop.f32.mrb[1].mxu0  ;;  %v537_v16 = vadd.f32 %v536_v60, %v4351_v11 }
 0x198   : > { %v2571_v59 = vpop.f32.mrb[6].mxu1  ;;  %v539_v18 = vadd.f32 %v538_v1, %v4353_v13 }
 0x199   : > { %v4347_v61 = vadd.f32 %v2571_v59, %v441_v41  ;;  %v679_v0 = vpop.f32.mrb[7].mxu1 }
 0x19a   : > { %v4349_v3 = vadd.f32 %v679_v0, %v441_v41 }
 0x1ac   : > { %v810_v19 = vpop.f32.mrb[8].mxu1 }
 0x1ad   : > { %v885_v22 = vadd.f32 %v810_v19, %v537_v16  ;;  %v812_v24 = vpop.f32.mrb[9].mxu1 }
 0x1ae   : > { %v892_v26 = vadd.f32 %v812_v24, %v539_v18 }
 0x1af   : > { %v2360_v27 = vmul.f32 -1.442695, %v885_v22 }
 0x1b0   : > { %v2361_v31 = vmul.f32 -1.442695, %v892_v26 }
 0x1b1   : > { %3519 = vpow2.f32 %v2360_v27 }
 0x1b2   : > { %3521 = vpow2.f32 %v2361_v31 }
 0x1bb   : > { %v3520_v29 = vpop.eup %3519 }
 0x1bc   : > { %v889_v33 = vadd.f32 1.0, %v3520_v29  ;;  %v3522_v38 = vpop.eup %3521 }
 0x1bd   : > { %v896_v53 = vadd.f32 1.0, %v3522_v38 }
 0x1be   : > { %3523 = vrcp.f32 %v889_v33 }
 0x1c8   : > { %v3524_v42 = vpop.eup %3523 }
 0x1cc   : > { %v881_v37 = vpop.f32.mrb[10].mxu1 }
 0x1cd   : > { %v899_v39 = vadd.f32 %v4360_v35, %v881_v37  ;;  %v2606_v40 = vpop.f32.mrb[11].mxu1 }
 0x1cf   : > { %v900_v49 = vmul.f32 %v3524_v42, %v899_v39 }
 0x1d1   : > { %v901_v55 = vadd.f32 %v900_v49, %v650_v47 }
 0x1d3   : > { %3525 = vtanh.f32 %v901_v55 }
 0x1d4   : > { %3527 = vrcp.f32 %v896_v53 }
 0x1dd   : > { %v3526_v59 = vpop.eup %3525 }
 0x1de   : > { %v903_v60 = vsub.f32 %v4259_v5, %v3526_v59  ;;  %v3528_v0 = vpop.eup %3527 }
 0x1e0   : > { %v904_v1 = vmul.f32 %v3528_v0, %v903_v60 }
 0x1e2   : > { %v4364_v4 = vadd.f32 %v3526_v59, %v904_v1 }
 0x1e4   : > { %971 = vmatmul.mubr.f32.vlgmr.msra.gmra.mrb[2].mxu0 %v4364_v4  ;;  %2640 = vmatmul.mubr.f32.vlgmr.msra.gmra.mrb[12].mxu1 %v4364_v4 }
 0x1e5   : > { %3019 = vmatpush1.bf16.msra.mxu0 %v4157_v14  ;;  %3050 = vmatpush3.bf16.msra.mxu1 %v4261_v6 }
 0x1e6   : > { %3021 = vmatprep.subr.bf16.mxu0 %v4160_v15  ;;  %3051 = vmatprep.subr.bf16.mxu1 %v3857_v9 }
 0x1e7   : > { %1132 = vmatprep.mubr.f32.mxu0 %v3856_v7  ;;  %2674 = vmatprep.mubr.msk.f32.mxu1 %vm3858_vm1, %v3856_v7 }
 0x1e9   : > { %3023 = vmatpush1.bf16.msra.mxu0 %v4165_v20  ;;  %3053 = vmatpush3.bf16.msra.mxu1 %v4271_v12 }
 0x1ea   : > { %3025 = vmatprep.subr.bf16.mxu0 %v4174_v23  ;;  %3054 = vmatprep.subr.bf16.mxu1 %v3857_v9 }
 0x1ed   : > { %3027 = vmatpush1.bf16.msra.mxu0 %v4187_v30  ;;  %3056 = vmatpush3.bf16.msra.mxu1 %v4282_v17 }
 0x1ee   : > { %3029 = vmatprep.subr.bf16.mxu0 %v4192_v34  ;;  %3057 = vmatprep.subr.bf16.mxu1 %v3857_v9 }
 0x1f1   : > { %3031 = vmatpush1.bf16.msra.mxu0 %v4200_v43  ;;  %3059 = vmatpush3.bf16.msra.mxu1 %v4291_v21 }
 0x1f2   : > { %3033 = vmatprep.subr.bf16.mxu0 %v4206_v45  ;;  %3060 = vmatprep.subr.bf16.mxu1 %v3857_v9 }
 0x1f5   : > { %3035 = vmatpush1.bf16.msra.mxu0 %v4216_v50  ;;  %3062 = vmatpush3.bf16.msra.mxu1 %v4298_v25 }
 0x1f6   : > { %3037 = vmatprep.subr.bf16.mxu0 %v4220_v51  ;;  %3063 = vmatprep.subr.bf16.mxu1 %v3857_v9 }
 0x1f9   : > { %3039 = vmatpush1.bf16.msra.mxu0 %v4228_v56  ;;  %3065 = vmatpush3.bf16.msra.mxu1 %v4302_v28 }
 0x1fa   : > { %3041 = vmatprep.subr.bf16.mxu0 %v4232_v57  ;;  %3066 = vmatprep.subr.bf16.mxu1 %v3857_v9 }
 0x1fd   : > { %3043 = vmatpush1.bf16.msra.mxu0 %v4239_v62  ;;  %3068 = vmatpush3.bf16.msra.mxu1 %v4306_v32 }
 0x1fe   : > { %3045 = vmatprep.subr.bf16.mxu0 %v4243_v63  ;;  %3069 = vmatprep.subr.bf16.mxu1 %v3857_v9 }
 0x201   : > { %3047 = vmatpush1.bf16.msra.mxu0 %v4250_v2  ;;  %3071 = vmatpush3.bf16.msra.mxu1 %v4310_v36 }
 0x202   : > { %3073 = vmatprep.subr.bf16.mxu0 %v4152_v8  ;;  %3104 = vmatprep.subr.bf16.mxu1 %v3857_v9 }
 0x2b7   : > { %v972_v5 = vpop.f32.mrb[2].mxu0  ;;  %v1043_v41 = vpop.f32.mrb[12].mxu1 }
 0x2b8   : > { %v3388_v46 = vadd.f32 %v972_v5, %v4351_v11  ;;  %v974_v10 = vpop.f32.mrb[3].mxu0  ;;  %v2641_v16 = vpop.f32.mrb[13].mxu1  ;;  %v1061_v29 = vadd.f32 %v4360_v35, %v1043_v41 }
 0x2b9   : > { %v3389_v19 = vadd.f32 %v974_v10, %v4353_v13 }
 0x2ba   : > { %v2362_v18 = vmul.f32 -1.442695, %v3388_v46 }
 0x2bb   : > { %v2363_v22 = vmul.f32 -1.442695, %v3389_v19 }
 0x2bc   : > { %3529 = vpow2.f32 %v2362_v18 }
 0x2bd   : > { %3531 = vpow2.f32 %v2363_v22 }
 0x2c6   : > { %v3530_v24 = vpop.eup %3529 }
 0x2c7   : > { %v1051_v26 = vadd.f32 1.0, %v3530_v24  ;;  %v3532_v27 = vpop.eup %3531 }
 0x2c8   : > { %v1058_v38 = vadd.f32 1.0, %v3532_v27 }
 0x2c9   : > { %3533 = vrcp.f32 %v1051_v26 }
 0x2d3   : > { %v3534_v31 = vpop.eup %3533 }
 0x2d4   : > { %v1062_v33 = vmul.f32 %v3534_v31, %v1061_v29 }
 0x2d6   : > { %v1063_v37 = vadd.f32 %v1062_v33, %v4337_v44 }
 0x2d8   : > { %3535 = vtanh.f32 %v1063_v37 }
 0x2d9   : > { %3537 = vrcp.f32 %v1058_v38 }
 0x2e2   : > { %v3536_v39 = vpop.eup %3535 }
 0x2e3   : > { %v1065_v40 = vsub.f32 %v4364_v4, %v3536_v39  ;;  %v3538_v42 = vpop.eup %3537 }
 0x2e5   : > { %v1066_v47 = vmul.f32 %v3538_v42, %v1065_v40 }
 0x2e7   : > { %v4408_v49 = vadd.f32 %v3536_v39, %v1066_v47 }
 0x2e9   : > { %1133 = vmatmul.mubr.f32.vlgmr.msra.gmra.mrb[4].mxu0 %v4408_v49  ;;  %2675 = vmatmul.mubr.f32.vlgmr.msra.gmra.mrb[14].mxu1 %v4408_v49 }
 0x2ea   : > { %3075 = vmatpush1.bf16.msra.mxu0 %v4157_v14  ;;  %3106 = vmatpush3.bf16.msra.mxu1 %v4261_v6 }
 0x2eb   : > { %3077 = vmatprep.subr.bf16.mxu0 %v4160_v15  ;;  %3107 = vmatprep.subr.bf16.mxu1 %v3857_v9 }
 0x2ec   : > { %1294 = vmatprep.mubr.f32.mxu0 %v3856_v7  ;;  %2709 = vmatprep.mubr.msk.f32.mxu1 %vm3858_vm1, %v3856_v7 }
 0x2ee   : > { %3079 = vmatpush1.bf16.msra.mxu0 %v4165_v20  ;;  %3109 = vmatpush3.bf16.msra.mxu1 %v4271_v12 }
 0x2ef   : > { %3081 = vmatprep.subr.bf16.mxu0 %v4174_v23  ;;  %3110 = vmatprep.subr.bf16.mxu1 %v3857_v9 }
 0x2f2   : > { %3083 = vmatpush1.bf16.msra.mxu0 %v4187_v30  ;;  %3112 = vmatpush3.bf16.msra.mxu1 %v4282_v17 }
 0x2f3   : > { %3085 = vmatprep.subr.bf16.mxu0 %v4192_v34  ;;  %3113 = vmatprep.subr.bf16.mxu1 %v3857_v9 }
 0x2f6   : > { %3087 = vmatpush1.bf16.msra.mxu0 %v4200_v43  ;;  %3115 = vmatpush3.bf16.msra.mxu1 %v4291_v21 }
 0x2f7   : > { %3089 = vmatprep.subr.bf16.mxu0 %v4206_v45  ;;  %3116 = vmatprep.subr.bf16.mxu1 %v3857_v9 }
 0x2fa   : > { %3091 = vmatpush1.bf16.msra.mxu0 %v4216_v50  ;;  %3118 = vmatpush3.bf16.msra.mxu1 %v4298_v25 }
 0x2fb   : > { %3093 = vmatprep.subr.bf16.mxu0 %v4220_v51  ;;  %3119 = vmatprep.subr.bf16.mxu1 %v3857_v9 }
 0x2fe   : > { %3095 = vmatpush1.bf16.msra.mxu0 %v4228_v56  ;;  %3121 = vmatpush3.bf16.msra.mxu1 %v4302_v28 }
 0x2ff   : > { %3097 = vmatprep.subr.bf16.mxu0 %v4232_v57  ;;  %3122 = vmatprep.subr.bf16.mxu1 %v3857_v9 }
 0x302   : > { %3099 = vmatpush1.bf16.msra.mxu0 %v4239_v62  ;;  %3124 = vmatpush3.bf16.msra.mxu1 %v4306_v32 }
 0x303   : > { %3101 = vmatprep.subr.bf16.mxu0 %v4243_v63  ;;  %3125 = vmatprep.subr.bf16.mxu1 %v3857_v9 }
 0x306   : > { %3103 = vmatpush1.bf16.msra.mxu0 %v4250_v2  ;;  %3127 = vmatpush3.bf16.msra.mxu1 %v4310_v36 }
 0x307   : > { %3129 = vmatprep.subr.bf16.mxu0 %v4152_v8  ;;  %3160 = vmatprep.subr.bf16.mxu1 %v3857_v9 }
 0x3bc   : > { %v1134_v44 = vpop.f32.mrb[4].mxu0  ;;  %v1205_v53 = vpop.f32.mrb[14].mxu1 }
 0x3bd   : > { %v3390_v55 = vadd.f32 %v1134_v44, %v4351_v11  ;;  %v1136_v59 = vpop.f32.mrb[5].mxu0  ;;  %v2676_v60 = vpop.f32.mrb[15].mxu1  ;;  %v1223_v16 = vadd.f32 %v4360_v35, %v1205_v53 }
 0x3be   : > { %v3391_v1 = vadd.f32 %v1136_v59, %v4353_v13 }
 0x3bf   : > { %v2364_v0 = vmul.f32 -1.442695, %v3390_v55 }
 0x3c0   : > { %v2365_v5 = vmul.f32 -1.442695, %v3391_v1 }
 0x3c1   : > { %3539 = vpow2.f32 %v2364_v0 }
 0x3c2   : > { %3541 = vpow2.f32 %v2365_v5 }
 0x3cb   : > { %v3540_v41 = vpop.eup %3539 }
 0x3cc   : > { %v1213_v46 = vadd.f32 1.0, %v3540_v41  ;;  %v3542_v10 = vpop.eup %3541 }
 0x3cd   : > { %v1220_v24 = vadd.f32 1.0, %v3542_v10 }
 0x3ce   : > { %3543 = vrcp.f32 %v1213_v46 }
 0x3d8   : > { %v3544_v18 = vpop.eup %3543 }
 0x3d9   : > { %v1224_v19 = vmul.f32 %v3544_v18, %v1223_v16 }
 0x3db   : > { %v1225_v22 = vadd.f32 %v1224_v19, %v4341_v52 }
 0x3dd   : > { %3545 = vtanh.f32 %v1225_v22 }
 0x3de   : > { %3547 = vrcp.f32 %v1220_v24 }
 0x3e7   : > { %v3546_v26 = vpop.eup %3545 }
 0x3e8   : > { %v1227_v27 = vsub.f32 %v4408_v49, %v3546_v26  ;;  %v3548_v29 = vpop.eup %3547 }
 0x3ea   : > { %v1228_v31 = vmul.f32 %v3548_v29, %v1227_v27 }
 0x3ec   : > { %v4452_v33 = vadd.f32 %v3546_v26, %v1228_v31 }
 0x3ee   : > { %1295 = vmatmul.mubr.f32.vlgmr.msra.gmra.mrb[6].mxu0 %v4452_v33  ;;  %2710 = vmatmul.mubr.f32.vlgmr.msra.gmra.mrb[16].mxu1 %v4452_v33 }
 0x3ef   : > { %3131 = vmatpush1.bf16.msra.mxu0 %v4157_v14  ;;  %3162 = vmatpush3.bf16.msra.mxu1 %v4261_v6 }
 0x3f0   : > { %3133 = vmatprep.subr.bf16.mxu0 %v4160_v15  ;;  %3163 = vmatprep.subr.bf16.mxu1 %v3857_v9 }
 0x3f1   : > { %1456 = vmatprep.mubr.f32.mxu0 %v3856_v7  ;;  %2744 = vmatprep.mubr.msk.f32.mxu1 %vm3858_vm1, %v3856_v7 }
 0x3f3   : > { %3135 = vmatpush1.bf16.msra.mxu0 %v4165_v20  ;;  %3165 = vmatpush3.bf16.msra.mxu1 %v4271_v12 }
 0x3f4   : > { %3137 = vmatprep.subr.bf16.mxu0 %v4174_v23  ;;  %3166 = vmatprep.subr.bf16.mxu1 %v3857_v9 }
 0x3f7   : > { %3139 = vmatpush1.bf16.msra.mxu0 %v4187_v30  ;;  %3168 = vmatpush3.bf16.msra.mxu1 %v4282_v17 }
 0x3f8   : > { %3141 = vmatprep.subr.bf16.mxu0 %v4192_v34  ;;  %3169 = vmatprep.subr.bf16.mxu1 %v3857_v9 }
 0x3fb   : > { %3143 = vmatpush1.bf16.msra.mxu0 %v4200_v43  ;;  %3171 = vmatpush3.bf16.msra.mxu1 %v4291_v21 }
 0x3fc   : > { %3145 = vmatprep.subr.bf16.mxu0 %v4206_v45  ;;  %3172 = vmatprep.subr.bf16.mxu1 %v3857_v9 }
 0x3ff   : > { %3147 = vmatpush1.bf16.msra.mxu0 %v4216_v50  ;;  %3174 = vmatpush3.bf16.msra.mxu1 %v4298_v25 }
 0x400   : > { %3149 = vmatprep.subr.bf16.mxu0 %v4220_v51  ;;  %3175 = vmatprep.subr.bf16.mxu1 %v3857_v9 }
 0x403   : > { %3151 = vmatpush1.bf16.msra.mxu0 %v4228_v56  ;;  %3177 = vmatpush3.bf16.msra.mxu1 %v4302_v28 }
 0x404   : > { %3153 = vmatprep.subr.bf16.mxu0 %v4232_v57  ;;  %3178 = vmatprep.subr.bf16.mxu1 %v3857_v9 }
 0x407   : > { %3155 = vmatpush1.bf16.msra.mxu0 %v4239_v62  ;;  %3180 = vmatpush3.bf16.msra.mxu1 %v4306_v32 }
 0x408   : > { %3157 = vmatprep.subr.bf16.mxu0 %v4243_v63  ;;  %3181 = vmatprep.subr.bf16.mxu1 %v3857_v9 }
 0x40b   : > { %3159 = vmatpush1.bf16.msra.mxu0 %v4250_v2  ;;  %3183 = vmatpush3.bf16.msra.mxu1 %v4310_v36 }
 0x40c   : > { %3185 = vmatprep.subr.bf16.mxu0 %v4152_v8  ;;  %3216 = vmatprep.subr.bf16.mxu1 %v3857_v9 }
 0x4c1   : > { %v1296_v52 = vpop.f32.mrb[6].mxu0  ;;  %v1367_v37 = vpop.f32.mrb[16].mxu1 }
 0x4c2   : > { %v3392_v38 = vadd.f32 %v1296_v52, %v4351_v11  ;;  %v1298_v39 = vpop.f32.mrb[7].mxu0  ;;  %v2711_v40 = vpop.f32.mrb[17].mxu1  ;;  %v1385_v60 = vadd.f32 %v4360_v35, %v1367_v37 }
 0x4c3   : > { %v3393_v47 = vadd.f32 %v1298_v39, %v4353_v13 }
 0x4c4   : > { %v2366_v42 = vmul.f32 -1.442695, %v3392_v38 }
 0x4c5   : > { %v2367_v44 = vmul.f32 -1.442695, %v3393_v47 }
 0x4c6   : > { %3549 = vpow2.f32 %v2366_v42 }
 0x4c7   : > { %3551 = vpow2.f32 %v2367_v44 }
 0x4d0   : > { %v3550_v53 = vpop.eup %3549 }
 0x4d1   : > { %v1375_v55 = vadd.f32 1.0, %v3550_v53  ;;  %v3552_v59 = vpop.eup %3551 }
 0x4d2   : > { %v1382_v41 = vadd.f32 1.0, %v3552_v59 }
 0x4d3   : > { %3553 = vrcp.f32 %v1375_v55 }
 0x4dd   : > { %v3554_v0 = vpop.eup %3553 }
 0x4de   : > { %v1386_v1 = vmul.f32 %v3554_v0, %v1385_v60 }
 0x4e0   : > { %v1387_v5 = vadd.f32 %v1386_v1, %v4339_v48 }
 0x4e2   : > { %3555 = vtanh.f32 %v1387_v5 }
 0x4e3   : > { %3557 = vrcp.f32 %v1382_v41 }
 0x4ec   : > { %v3556_v46 = vpop.eup %3555 }
 0x4ed   : > { %v1389_v10 = vsub.f32 %v4452_v33, %v3556_v46  ;;  %v3558_v16 = vpop.eup %3557 }
 0x4ef   : > { %v1390_v18 = vmul.f32 %v3558_v16, %v1389_v10 }
 0x4f1   : > { %v4496_v19 = vadd.f32 %v3556_v46, %v1390_v18 }
 0x4f3   : > { %1457 = vmatmul.mubr.f32.vlgmr.msra.gmra.mrb[8].mxu0 %v4496_v19  ;;  %2745 = vmatmul.mubr.f32.vlgmr.msra.gmra.mrb[18].mxu1 %v4496_v19 }
 0x4f4   : > { %3187 = vmatpush1.bf16.msra.mxu0 %v4157_v14  ;;  %3218 = vmatpush3.bf16.msra.mxu1 %v4261_v6 }
 0x4f5   : > { %3189 = vmatprep.subr.bf16.mxu0 %v4160_v15  ;;  %3219 = vmatprep.subr.bf16.mxu1 %v3857_v9 }
 0x4f6   : > { %1618 = vmatprep.mubr.f32.mxu0 %v3856_v7  ;;  %2779 = vmatprep.mubr.msk.f32.mxu1 %vm3858_vm1, %v3856_v7 }
 0x4f8   : > { %3191 = vmatpush1.bf16.msra.mxu0 %v4165_v20  ;;  %3221 = vmatpush3.bf16.msra.mxu1 %v4271_v12 }
 0x4f9   : > { %3193 = vmatprep.subr.bf16.mxu0 %v4174_v23  ;;  %3222 = vmatprep.subr.bf16.mxu1 %v3857_v9 }
 0x4fc   : > { %3195 = vmatpush1.bf16.msra.mxu0 %v4187_v30  ;;  %3224 = vmatpush3.bf16.msra.mxu1 %v4282_v17 }
 0x4fd   : > { %3197 = vmatprep.subr.bf16.mxu0 %v4192_v34  ;;  %3225 = vmatprep.subr.bf16.mxu1 %v3857_v9 }
 0x500   : > { %3199 = vmatpush1.bf16.msra.mxu0 %v4200_v43  ;;  %3227 = vmatpush3.bf16.msra.mxu1 %v4291_v21 }
 0x501   : > { %3201 = vmatprep.subr.bf16.mxu0 %v4206_v45  ;;  %3228 = vmatprep.subr.bf16.mxu1 %v3857_v9 }
 0x504   : > { %3203 = vmatpush1.bf16.msra.mxu0 %v4216_v50  ;;  %3230 = vmatpush3.bf16.msra.mxu1 %v4298_v25 }
 0x505   : > { %3205 = vmatprep.subr.bf16.mxu0 %v4220_v51  ;;  %3231 = vmatprep.subr.bf16.mxu1 %v3857_v9 }
 0x508   : > { %3207 = vmatpush1.bf16.msra.mxu0 %v4228_v56  ;;  %3233 = vmatpush3.bf16.msra.mxu1 %v4302_v28 }
 0x509   : > { %3209 = vmatprep.subr.bf16.mxu0 %v4232_v57  ;;  %3234 = vmatprep.subr.bf16.mxu1 %v3857_v9 }
 0x50c   : > { %3211 = vmatpush1.bf16.msra.mxu0 %v4239_v62  ;;  %3236 = vmatpush3.bf16.msra.mxu1 %v4306_v32 }
 0x50d   : > { %3213 = vmatprep.subr.bf16.mxu0 %v4243_v63  ;;  %3237 = vmatprep.subr.bf16.mxu1 %v3857_v9 }
 0x510   : > { %3215 = vmatpush1.bf16.msra.mxu0 %v4250_v2  ;;  %3239 = vmatpush3.bf16.msra.mxu1 %v4310_v36 }
 0x511   : > { %3241 = vmatprep.subr.bf16.mxu0 %v4152_v8  ;;  %3272 = vmatprep.subr.bf16.mxu1 %v3857_v9 }
 0x5c6   : > { %v1458_v48 = vpop.f32.mrb[8].mxu0  ;;  %v1529_v22 = vpop.f32.mrb[18].mxu1 }
 0x5c7   : > { %v3394_v24 = vadd.f32 %v1458_v48, %v4351_v11  ;;  %v1460_v26 = vpop.f32.mrb[9].mxu0  ;;  %v2746_v27 = vpop.f32.mrb[19].mxu1  ;;  %v1547_v40 = vadd.f32 %v4360_v35, %v1529_v22 }
 0x5c8   : > { %v3395_v31 = vadd.f32 %v1460_v26, %v4353_v13 }
 0x5c9   : > { %v2368_v29 = vmul.f32 -1.442695, %v3394_v24 }
 0x5ca   : > { %v2369_v52 = vmul.f32 -1.442695, %v3395_v31 }
 0x5cb   : > { %3559 = vpow2.f32 %v2368_v29 }
 0x5cc   : > { %3561 = vpow2.f32 %v2369_v52 }
 0x5d5   : > { %v3560_v37 = vpop.eup %3559 }
 0x5d6   : > { %v1537_v38 = vadd.f32 1.0, %v3560_v37  ;;  %v3562_v39 = vpop.eup %3561 }
 0x5d7   : > { %v1544_v53 = vadd.f32 1.0, %v3562_v39 }
 0x5d8   : > { %3563 = vrcp.f32 %v1537_v38 }
 0x5e2   : > { %v3564_v42 = vpop.eup %3563 }
 0x5e3   : > { %v1548_v47 = vmul.f32 %v3564_v42, %v1547_v40 }
 0x5e5   : > { %v1549_v44 = vadd.f32 %v1548_v47, %v4345_v58 }
 0x5e7   : > { %3565 = vtanh.f32 %v1549_v44  ;;  %v2046_v44 = vld [vmem:[#allocation11 + $0x20] sm:$0xff] }
 0x5e8   : > { %3567 = vrcp.f32 %v1544_v53  ;;  %v2047_v53 = vld [vmem:[#allocation11 + $0x28] sm:$0xff] }
 0x5f1   : > { %v3566_v55 = vpop.eup %3565 }
 0x5f2   : > { %v1551_v59 = vsub.f32 %v4496_v19, %v3566_v55  ;;  %v3568_v60 = vpop.eup %3567 }
 0x5f4   : > { %v1552_v0 = vmul.f32 %v3568_v60, %v1551_v59  ;;  %v2049_v59 = vld [vmem:[#allocation11 + $0x38] sm:$0xff] }
 0x5f6   : > { %v4540_v1 = vadd.f32 %v3566_v55, %v1552_v0  ;;  %v2048_v55 = vld [vmem:[#allocation11 + $0x30] sm:$0xff]  ;;  %v2050_v0 = vld [vmem:[#allocation11 + $0x40] sm:$0xff] }
 0x5f7   : > { %v3364_v60 = vpack.c.bf16 %v2049_v59, %v2048_v55 }
 0x5f8   : > { %1619 = vmatmul.mubr.f32.vlgmr.msra.gmra.mrb[10].mxu0 %v4540_v1  ;;  %2780 = vmatmul.mubr.f32.vlgmr.msra.gmra.mrb[20].mxu1 %v4540_v1 }
 0x5f9   : > { %3243 = vmatpush1.bf16.msra.mxu0 %v4157_v14  ;;  %3274 = vmatpush3.bf16.msra.mxu1 %v4261_v6 }
 0x5fa   : > { %3245 = vmatprep.subr.bf16.mxu0 %v4160_v15  ;;  %3275 = vmatprep.subr.bf16.mxu1 %v3857_v9 }
 0x5fb   : > { %1780 = vmatprep.mubr.f32.mxu0 %v3856_v7  ;;  %2814 = vmatprep.mubr.msk.f32.mxu1 %vm3858_vm1, %v3856_v7 }
 0x5fd   : > { %3247 = vmatpush1.bf16.msra.mxu0 %v4165_v20  ;;  %3277 = vmatpush3.bf16.msra.mxu1 %v4271_v12 }
 0x5fe   : > { %3249 = vmatprep.subr.bf16.mxu0 %v4174_v23  ;;  %3278 = vmatprep.subr.bf16.mxu1 %v3857_v9 }
 0x601   : > { %3251 = vmatpush1.bf16.msra.mxu0 %v4187_v30  ;;  %3280 = vmatpush3.bf16.msra.mxu1 %v4282_v17 }
 0x602   : > { %3253 = vmatprep.subr.bf16.mxu0 %v4192_v34  ;;  %3281 = vmatprep.subr.bf16.mxu1 %v3857_v9 }
 0x605   : > { %3255 = vmatpush1.bf16.msra.mxu0 %v4200_v43  ;;  %3283 = vmatpush3.bf16.msra.mxu1 %v4291_v21 }
 0x606   : > { %3257 = vmatprep.subr.bf16.mxu0 %v4206_v45  ;;  %3284 = vmatprep.subr.bf16.mxu1 %v3857_v9 }
 0x609   : > { %3259 = vmatpush1.bf16.msra.mxu0 %v4216_v50  ;;  %3286 = vmatpush3.bf16.msra.mxu1 %v4298_v25 }
 0x60a   : > { %3261 = vmatprep.subr.bf16.mxu0 %v4220_v51  ;;  %3287 = vmatprep.subr.bf16.mxu1 %v3857_v9 }
 0x60d   : > { %3263 = vmatpush1.bf16.msra.mxu0 %v4228_v56  ;;  %3289 = vmatpush3.bf16.msra.mxu1 %v4302_v28 }
 0x60e   : > { %3265 = vmatprep.subr.bf16.mxu0 %v4232_v57  ;;  %3290 = vmatprep.subr.bf16.mxu1 %v3857_v9 }
 0x611   : > { %3267 = vmatpush1.bf16.msra.mxu0 %v4239_v62  ;;  %3292 = vmatpush3.bf16.msra.mxu1 %v4306_v32 }
 0x612   : > { %3269 = vmatprep.subr.bf16.mxu0 %v4243_v63  ;;  %3293 = vmatprep.subr.bf16.mxu1 %v3857_v9 }
 0x615   : > { %3271 = vmatpush1.bf16.msra.mxu0 %v4250_v2  ;;  %3295 = vmatpush3.bf16.msra.mxu1 %v4310_v36 }
 0x616   : > { %3297 = vmatprep.subr.bf16.mxu0 %v4152_v8  ;;  %3328 = vmatprep.subr.bf16.mxu1 %v3857_v9 }
 0x6cb   : > { %v1620_v58 = vpop.f32.mrb[10].mxu0  ;;  %v1691_v5 = vpop.f32.mrb[20].mxu1 }
 0x6cc   : > { %v3396_v41 = vadd.f32 %v1620_v58, %v4351_v11  ;;  %v1622_v46 = vpop.f32.mrb[11].mxu0  ;;  %v2781_v10 = vpop.f32.mrb[21].mxu1  ;;  %v1709_v8 = vadd.f32 %v4360_v35, %v1691_v5  ;;  %v2051_v58 = vld [vmem:[#allocation11 + $0x48] sm:$0xff] }
 0x6cd   : > { %v3397_v18 = vadd.f32 %v1622_v46, %v4353_v13  ;;  %v3368_v5 = vpack.c.bf16 %v2051_v58, %v2050_v0  ;;  %v2053_v46 = vld [vmem:[#allocation11 + $0x58] sm:$0xff] }
 0x6ce   : > { %v2370_v16 = vmul.f32 -1.442695, %v3396_v41  ;;  %v2052_v41 = vld [vmem:[#allocation11 + $0x50] sm:$0xff] }
 0x6cf   : > { %v2371_v48 = vmul.f32 -1.442695, %v3397_v18  ;;  %v3372_v10 = vpack.c.bf16 %v2053_v46, %v2052_v41  ;;  %v2055_v18 = vld [vmem:[#allocation11 + $0x68] sm:$0xff] }
 0x6d0   : > { %3569 = vpow2.f32 %v2370_v16  ;;  %v2054_v16 = vld [vmem:[#allocation11 + $0x60] sm:$0xff] }
 0x6d1   : > { %3571 = vpow2.f32 %v2371_v48  ;;  %v2056_v48 = vld [vmem:[#allocation11 + $0x70] sm:$0xff] }
 0x6da   : > { %v3570_v22 = vpop.eup %3569 }
 0x6db   : > { %v1699_v24 = vadd.f32 1.0, %v3570_v22  ;;  %v3572_v26 = vpop.eup %3571  ;;  %v2057_v22 = vld [vmem:[#allocation11 + $0x78] sm:$0xff] }
 0x6dc   : > { %v1706_v52 = vadd.f32 1.0, %v3572_v26 }
 0x6dd   : > { %3573 = vrcp.f32 %v1699_v24  ;;  %v3380_v24 = vpack.c.bf16 %v2057_v22, %v2056_v48 }
 0x6e7   : > { %v3574_v27 = vpop.eup %3573 }
 0x6e8   : > { %v1710_v29 = vmul.f32 %v3574_v27, %v1709_v8 }
 0x6ea   : > { %v1711_v31 = vadd.f32 %v1710_v29, %v4343_v54 }
 0x6ec   : > { %3575 = vtanh.f32 %v1711_v31 }
 0x6ed   : > { %3577 = vrcp.f32 %v1706_v52 }
 0x6f6   : > { %v3576_v37 = vpop.eup %3575 }
 0x6f7   : > { %v1713_v38 = vsub.f32 %v4540_v1, %v3576_v37  ;;  %v3578_v39 = vpop.eup %3577 }
 0x6f9   : > { %v1714_v40 = vmul.f32 %v3578_v39, %v1713_v38 }
 0x6fb   : > { %v4584_v42 = vadd.f32 %v3576_v37, %v1714_v40 }
 0x6fd   : > { %1781 = vmatmul.mubr.f32.vlgmr.msra.gmra.mrb[12].mxu0 %v4584_v42  ;;  %2815 = vmatmul.mubr.f32.vlgmr.msra.gmra.mrb[22].mxu1 %v4584_v42 }
 0x6fe   : > { %3299 = vmatpush1.bf16.msra.mxu0 %v4157_v14  ;;  %3330 = vmatpush3.bf16.msra.mxu1 %v4261_v6  ;;  %v2043_v14 = vld [vmem:[#allocation11 + $0x8] sm:$0xff] }
 0x6ff   : > { %3301 = vmatprep.subr.bf16.mxu0 %v4160_v15  ;;  %3331 = vmatprep.subr.bf16.mxu1 %v3857_v9 }
 0x700   : > { %1942 = vmatprep.mubr.f32.mxu0 %v3856_v7  ;;  %2849 = vmatprep.mubr.msk.f32.mxu1 %vm3858_vm1, %v3856_v7  ;;  %v2042_v7 = vld [vmem:[#allocation11] sm:$0xff] }
 0x701   : > { %v3352_v15 = vpack.c.bf16 %v2043_v14, %v2042_v7 }
 0x702   : > { %3303 = vmatpush1.bf16.msra.mxu0 %v4165_v20  ;;  %3333 = vmatpush3.bf16.msra.mxu1 %v4271_v12 }
 0x703   : > { %3305 = vmatprep.subr.bf16.mxu0 %v4174_v23  ;;  %3334 = vmatprep.subr.bf16.mxu1 %v3857_v9 }
 0x706   : > { %3307 = vmatpush1.bf16.msra.mxu0 %v4187_v30  ;;  %3336 = vmatpush3.bf16.msra.mxu1 %v4282_v17 }
 0x707   : > { %3309 = vmatprep.subr.bf16.mxu0 %v4192_v34  ;;  %3337 = vmatprep.subr.bf16.mxu1 %v3857_v9 }
 0x70a   : > { %3311 = vmatpush1.bf16.msra.mxu0 %v4200_v43  ;;  %3339 = vmatpush3.bf16.msra.mxu1 %v4291_v21 }
 0x70b   : > { %3313 = vmatprep.subr.bf16.mxu0 %v4206_v45  ;;  %3340 = vmatprep.subr.bf16.mxu1 %v3857_v9 }
 0x70e   : > { %3315 = vmatpush1.bf16.msra.mxu0 %v4216_v50  ;;  %3342 = vmatpush3.bf16.msra.mxu1 %v4298_v25 }
 0x70f   : > { %3317 = vmatprep.subr.bf16.mxu0 %v4220_v51  ;;  %3343 = vmatprep.subr.bf16.mxu1 %v3857_v9 }
 0x712   : > { %3319 = vmatpush1.bf16.msra.mxu0 %v4228_v56  ;;  %3345 = vmatpush3.bf16.msra.mxu1 %v4302_v28  ;;  %v2044_v28 = vld [vmem:[#allocation11 + $0x10] sm:$0xff] }
 0x713   : > { %3321 = vmatprep.subr.bf16.mxu0 %v4232_v57  ;;  %3346 = vmatprep.subr.bf16.mxu1 %v3857_v9 }
 0x716   : > { %3323 = vmatpush1.bf16.msra.mxu0 %v4239_v62  ;;  %3348 = vmatpush3.bf16.msra.mxu1 %v4306_v32  ;;  %v2045_v32 = vld [vmem:[#allocation11 + $0x18] sm:$0xff] }
 0x717   : > { %3325 = vmatprep.subr.bf16.mxu0 %v4243_v63  ;;  %3349 = vmatprep.subr.bf16.mxu1 %v3857_v9  ;;  %v3356_v47 = vpack.c.bf16 %v2045_v32, %v2044_v28 }
 0x71a   : > { %3327 = vmatpush1.bf16.msra.mxu0 %v4250_v2  ;;  %3351 = vmatpush3.bf16.msra.mxu1 %v4310_v36 }
 0x71b   : > { %3353 = vmatprep.subr.bf16.mxu0 %v3352_v15 }
 0x7d0   : > { %v1782_v20 = vpop.f32.mrb[12].mxu0  ;;  %v1853_v23 = vpop.f32.mrb[22].mxu1 }
 0x7d1   : > { %v3398_v30 = vadd.f32 %v1782_v20, %v4351_v11  ;;  %v1784_v34 = vpop.f32.mrb[13].mxu0  ;;  %v2816_v43 = vpop.f32.mrb[23].mxu1  ;;  %v1871_v63 = vadd.f32 %v4360_v35, %v1853_v23 }
 0x7d2   : > { %v3399_v50 = vadd.f32 %v1784_v34, %v4353_v13 }
 0x7d3   : > { %v2372_v45 = vmul.f32 -1.442695, %v3398_v30 }
 0x7d4   : > { %v2373_v51 = vmul.f32 -1.442695, %v3399_v50 }
 0x7d5   : > { %3579 = vpow2.f32 %v2372_v45 }
 0x7d6   : > { %3581 = vpow2.f32 %v2373_v51 }
 0x7df   : > { %v3580_v56 = vpop.eup %3579 }
 0x7e0   : > { %v1861_v57 = vadd.f32 1.0, %v3580_v56  ;;  %v3582_v62 = vpop.eup %3581 }
 0x7e1   : > { %v1868_v12 = vadd.f32 1.0, %v3582_v62 }
 0x7e2   : > { %3583 = vrcp.f32 %v1861_v57 }
 0x7ec   : > { %v3584_v2 = vpop.eup %3583 }
 0x7ed   : > { %v1872_v6 = vmul.f32 %v3584_v2, %v1871_v63 }
 0x7ef   : > { %v1873_v9 = vadd.f32 %v1872_v6, %v4349_v3  ;;  %v3360_v3 = vpack.c.bf16 %v2047_v53, %v2046_v44 }
 0x7f1   : > { %3585 = vtanh.f32 %v1873_v9 }
 0x7f2   : > { %3587 = vrcp.f32 %v1868_v12 }
 0x7fb   : > { %v3586_v17 = vpop.eup %3585 }
 0x7fc   : > { %v1875_v21 = vsub.f32 %v4584_v42, %v3586_v17  ;;  %v3588_v25 = vpop.eup %3587 }
 0x7fe   : > { %v1876_v36 = vmul.f32 %v3588_v25, %v1875_v21 }
 0x800   : > { %v4626_v54 = vadd.f32 %v3586_v17, %v1876_v36 }
 0x802   : > { %1943 = vmatmul.mubr.f32.vlgmr.msra.gmra.mrb[14].mxu0 %v4626_v54  ;;  %2850 = vmatmul.mubr.f32.vlgmr.msra.gmra.mrb[24].mxu1 %v4626_v54 }
 0x803   : > { %3355 = vmatpush3.bf16.msra.mxu0 %v3352_v15  ;;  %2884 = vmatprep.mubr.f32.mxu0 %v4364_v4  ;;  %v3376_v4 = vpack.c.bf16 %v2055_v18, %v2054_v16 }
 0x804   : > { %3357 = vmatprep.subr.bf16.mxu0 %v3356_v47 }
 0x807   : > { %3359 = vmatpush3.bf16.msra.mxu0 %v3356_v47 }
 0x808   : > { %3361 = vmatprep.subr.bf16.mxu0 %v3360_v3 }
 0x80b   : > { %3363 = vmatpush3.bf16.msra.mxu0 %v3360_v3 }
 0x80c   : > { %3365 = vmatprep.subr.bf16.mxu0 %v3364_v60 }
 0x80f   : > { %3367 = vmatpush3.bf16.msra.mxu0 %v3364_v60 }
 0x810   : > { %3369 = vmatprep.subr.bf16.mxu0 %v3368_v5 }
 0x813   : > { %3371 = vmatpush3.bf16.msra.mxu0 %v3368_v5 }
 0x814   : > { %3373 = vmatprep.subr.bf16.mxu0 %v3372_v10 }
 0x817   : > { %3375 = vmatpush3.bf16.msra.mxu0 %v3372_v10 }
 0x818   : > { %3377 = vmatprep.subr.bf16.mxu0 %v3376_v4 }
 0x81b   : > { %3379 = vmatpush3.bf16.msra.mxu0 %v3376_v4 }
 0x81c   : > { %3381 = vmatprep.subr.bf16.mxu0 %v3380_v24 }
 0x81f   : > { %3383 = vmatpush3.bf16.msra.mxu0 %v3380_v24 }
 0x822   : > { %2885 = vmatmul.mubr.f32.vlgmr.msra.gmra.mrb[16].mxu0 %v4408_v49 }
 0x823   : > { %2887 = vmatprep.mubr.f32.mxu0 %v4452_v33 }
 0x826   : > { %2888 = vmatmul.mubr.f32.gmra.mrb[18].mxu0 %v4496_v19 }
 0x827   : > { %2890 = vmatprep.mubr.f32.mxu0 %v4540_v1 }
 0x82a   : > { %2891 = vmatmul.mubr.f32.gmra.mrb[20].mxu0 %v4584_v42 }
 0x82b   : > { %2893 = vmatprep.mubr.f32.mxu0 %v4626_v54 }
 0x8d5   : > { %v1944_v26 = vpop.f32.mrb[14].mxu0  ;;  %v2015_v8 = vpop.f32.mrb[24].mxu1 }
 0x8d6   : > { %v3400_v27 = vadd.f32 %v1944_v26, %v4351_v11  ;;  %v1946_v29 = vpop.f32.mrb[15].mxu0  ;;  %v2851_v31 = vpop.f32.mrb[25].mxu1  ;;  %v2033_v1 = vadd.f32 %v4360_v35, %v2015_v8  ;;  %v2376_v11 = vld [vmem:[%s4733_s7] ss:$0 sm:$0xff] }
 0x8d7   : > { %v3401_v49 = vadd.f32 %v1946_v29, %v4353_v13 }
 0x8d8   : > { %v2374_v52 = vmul.f32 -1.442695, %v3400_v27 }
 0x8d9   : > { %v2375_v37 = vmul.f32 -1.442695, %v3401_v49 }
 0x8da   : > { %3589 = vpow2.f32 %v2374_v52 }
 0x8db   : > { %3591 = vpow2.f32 %v2375_v37 }
 0x8e4   : > { %v3590_v33 = vpop.eup %3589 }
 0x8e5   : > { %v2023_v38 = vadd.f32 1.0, %v3590_v33  ;;  %v3592_v19 = vpop.eup %3591 }
 0x8e6   : > { %v2030_v42 = vadd.f32 1.0, %v3592_v19 }
 0x8e7   : > { %3593 = vrcp.f32 %v2023_v38 }
 0x8f1   : > { %v3594_v39 = vpop.eup %3593 }
 0x8f2   : > { %v2034_v40 = vmul.f32 %v3594_v39, %v2033_v1 }
 0x8f4   : > { %v2035_v13 = vadd.f32 %v2034_v40, %v4347_v61 }
 0x8f5   : > { %v2886_v7 = vpop.f32.mrb[16].mxu0 }
 0x8f6   : > { %3595 = vtanh.f32 %v2035_v13  ;;  %v2137_v14 = vadd.f32 %v2886_v7, %v2376_v11  ;;  %v2131_v15 = vpop.f32.mrb[17].mxu0 }
 0x8f7   : > { %v2132_v20 = vadd.f32 %v2376_v11, %v2131_v15  ;;  %3597 = vrcp.f32 %v2030_v42 }
 0x8f8   : > { %2171 = vst [vmem:[%s4142_s17 + $0x8] sm:$0xff] %v2137_v14 }
 0x8f9   : > { %2170 = vst [vmem:[%s4142_s17] sm:$0xff] %v2132_v20  ;;  %v2889_v35 = vpop.f32.mrb[18].mxu0 }
 0x8fa   : > { %v2147_v23 = vadd.f32 %v2889_v35, %v2376_v11  ;;  %v2141_v30 = vpop.f32.mrb[19].mxu0 }
 0x8fb   : > { %v2142_v34 = vadd.f32 %v2376_v11, %v2141_v30 }
 0x8fc   : > { %2173 = vst [vmem:[%s4142_s17 + $0x18] sm:$0xff] %v2147_v23 }
 0x8fd   : > { %2172 = vst [vmem:[%s4142_s17 + $0x10] sm:$0xff] %v2142_v34  ;;  %v2892_v43 = vpop.f32.mrb[20].mxu0 }
 0x8fe   : > { %v2157_v45 = vadd.f32 %v2892_v43, %v2376_v11  ;;  %v2151_v61 = vpop.f32.mrb[21].mxu0 }
 0x8ff   : > { %v2152_v50 = vadd.f32 %v2376_v11, %v2151_v61 }
 0x900   : > { %v3596_v51 = vpop.eup %3595  ;;  %2175 = vst [vmem:[%s4142_s17 + $0x28] sm:$0xff] %v2157_v45 }
 0x901   : > { %2174 = vst [vmem:[%s4142_s17 + $0x20] sm:$0xff] %v2152_v50  ;;  %v2037_v56 = vsub.f32 %v4626_v54, %v3596_v51  ;;  %v3598_v57 = vpop.eup %3597 }
 0x903   : > { %v2038_v62 = vmul.f32 %v3598_v57, %v2037_v56 }
 0x905   : > { %v2039_v63 = vadd.f32 %v3596_v51, %v2038_v62 }
 0x907   : > { %2040 = vst [vmem:[#allocation2] sm:$0xff] %v2039_v63  ;;  %2894 = vmatmul.mubr.f32.gmra.mrb[22].mxu0 %v2039_v63  ;;  %2041 = vst [vmem:[#allocation13] sm:$0xff] %v2039_v63 }
 0x908   : > { %3754 = shalt.err (!%p3751_p5)
}
 0x909   : > { %s3755_s24 = scalar_lea.hbm %s4735_s9, 128  ;;  %p4761_p8 = pmov %p4760_p9 }
 0x90a   : > { %p3756_p12 = scmp.ne.s32.totalorder %s4735_s9, %s3755_s24  ;;  %p3761_p1 = scmp.lt.u32.totalorder %s3755_s24, %s4735_s9 }
 0x90c   : > { %p3757_p10 = pnand %p3756_p12, %p4761_p8 }
 0x90e   : > { %p3758_p2 = pneg %p3757_p10 }
 0x910   : > { %p3763_p6 = pnand %p3761_p1, %p3758_p2 }
 0x912   : > { %3766 = shalt.err (!%p3763_p6)
}
 0x913   : > { %p4762_p9 = pmov %p4761_p8  ;;  %s2385_s16 = sshll.u32 %s3934_s13, 10 }
 0x914   : > { %s2192_s27 = sshll.u32 %s4142_s17, 4  ;;  %s4674_s23 = scalar_lea.hbm %s4734_s8, %s2385_s16  ;;  %s4676_s27 = int_to_ptr.vmem [resolvable:$true] %s2192_s27 }
 0x915   : > { %3436 = dma.vmem_to_hbm [thread:$0]  (%p4762_p9), %s2207_s21, 128, %s4735_s9, [#allocation14]  }
 0x916   : > { %s2179_s24 = scalar_lea.sflag [#allocation5], %s4124_s1  ;;  %s3767_s21 = scalar_lea.vmem %s4676_s27, 1024 }
 0x917   : > { %p3768_p3 = scmp.ne.s32.totalorder %s4676_s27, %s3767_s21  ;;  %s3860_s18 = smov [#allocation12]  }
 0x918   : > { %s3771_s15 = sshll.u32 %s3860_s18, 4  ;;  %s3772_s15 = int_to_ptr.vmem [resolvable:$false] %s3771_s15 }
 0x919   : > { %p3769_p7 = pnand %p3768_p3, %p4072_p4  ;;  %s3773_s25 = scalar_lea.vmem %s3772_s15, 2048 }
 0x91a   : > { %p3774_p0 = scmp.lt.s32.totalorder %s4676_s27, %s3772_s15  ;;  %p3775_p13 = scmp.lt.s32.totalorder %s3773_s25, %s3767_s21 }
 0x91b   : > { %p3770_p11 = pneg %p3769_p7 }
 0x91c   : > { %p3776_p5 = por %p3775_p13, %p3774_p0 }
 0x91e   : > { %p3777_p12 = pnand %p3776_p5, %p3770_p11 }
 0x9da   : > { %v2895_v2 = vpop.f32.mrb[22].mxu0 }
 0x9db   : > { %v2167_v6 = vadd.f32 %v2895_v2, %v2376_v11  ;;  %v2161_v9 = vpop.f32.mrb[23].mxu0 }
 0x9dc   : > { %v2162_v12 = vadd.f32 %v2376_v11, %v2161_v9 }
 0x9dd   : > { %2177 = vst [vmem:[%s4142_s17 + $0x38] sm:$0xff] %v2167_v6 }
 0x9de   : > { %2176 = vst [vmem:[%s4142_s17 + $0x30] sm:$0xff] %v2162_v12 }
 0x9df   : > { %3780 = shalt.err (!%p3777_p12)
}
 0x9e0   : > { %s3781_s17 = scalar_lea.hbm %s4674_s23, 1024  ;;  %s3785_s14 = scalar_lea.hbm %s4734_s8, 2048 }
 0x9e1   : > { %p3782_p8 = scmp.ne.s32.totalorder %s4674_s23, %s3781_s17  ;;  %p3786_p1 = scmp.lt.u32.totalorder %s4674_s23, %s4734_s8 }
 0x9e2   : > { %p3787_p6 = scmp.lt.u32.totalorder %s3785_s14, %s3781_s17  ;;  %p3789_p3 = scmp.lt.u32.totalorder %s3781_s17, %s4674_s23 }
 0x9e3   : > { %p3783_p10 = pnand %p3782_p8, %p4072_p4 }
 0x9e4   : > { %p3788_p9 = por %p3787_p6, %p3786_p1 }
 0x9e5   : > { %p3784_p2 = pneg %p3783_p10 }
 0x9e6   : > { %p3790_p7 = por %p3789_p3, %p3788_p9 }
 0x9e8   : > { %p3791_p11 = pnand %p3790_p7, %p3784_p2 }
 0x9ea   : > { %3794 = shalt.err (!%p3791_p11)
}
 0x9eb   : > { %s3861_s19 = smov 128   ;;  %s3862_s21 = smov 8  }
 0x9ec   : > { %3434 = dma.vmem_to_hbm [thread:$0]  (%p4072_p4), %s4676_s27, 1024, %s4674_s23, %s2179_s24, %s3861_s19, %s3861_s19, %s3862_s21  }
 0x9ed   : > { %p4763_p0 = scmp.eq.s32.totalorder %s3934_s13, 1 }
 0x9ef   : > { %3824 = dma.done.wait (%p4763_p0), [#allocation14], 128   ;;  %p4764_p13 = pmov %p4763_p0 }
 0x9f1   : > { %3826 = vsyncadd (%p4764_p13), [#allocation14], 4294967168 }
 0x9f2 PF: > { %s4765_s18 = sld [smem:[#allocation20_spill]]  ;;  %s2222_s15 = sand.u32 1, %s3833_s30  }
 0x9f3   : > { %p4767_p12 = scmp.ge.s32.totalorder %s3845_s12, 2  ;;  %s2223_s25 = scalar_lea.sflag [#allocation5], %s2222_s15 }
 0x9f8   : > { %p4766_p5 = scmp.ne.s32.totalorder %s4765_s18, 0 }
 0x9fa   : > { %p3458_p8 = pnand %p4767_p12, %p4766_p5 }
 0x9fc   : > { %3828 = dma.done.wait (!%p3458_p8), %s2223_s25, 1024  }
 0x9fd   : > { %3830 = vsyncadd (!%p3458_p8), %s2223_s25, 4294966272  ;;  %p26_p4 = scmp.ge.s32.totalorder %s4059_s22, 4   ;;  %s4768_s30 = smov %s3837_s10 }
 0x9fe   : > { %s4769_s10 = smov %s3841_s11  ;;  %s4770_s11 = smov %s4068_s29 }
 0x9ff   : > { %s4771_s12 = smov %s4059_s22  ;;  %28 = sbr.rel (!%p26_p4) target bundleno = 11 (0xb), region = 125 }
 0xa06   :  { %2228 = vsyncpa [#allocation4], 1 }
 0xa07   :  { %2230 = vsyncpa [#allocation4 + $0x1], 1 }
 0xa08   :  { %2231 = vsyncpa [#allocation7], 1 }
 0xa09   :  { %2232 = vsyncpa [#allocation10], 1 }
 0xa0a   :  { %2233 = vsyncpa [#allocation5], 1 }
 0xa0b   :  { %2235 = vsyncpa [#allocation5 + $0x1], 1 }
 0xa0c   :  { %2236 = vsyncpa [#allocation14], 1 }

</bundles_post_ra>
